<compile_context>
chip_gen: v6e
topology: v6e:2x2x1
jax: 0.10.0
libtpu: 0.0.40
codegen_flags: <defaults>
</compile_context>

<pallas_src>
import functools

import jax
import jax.numpy as jnp
from jax import lax
from jax.experimental import pallas as pl
from jax.experimental.pallas import tpu as pltpu

LANE = 128
SUBLANE = 8
# Fits inside v7x's 64 MiB physical VMEM with headroom; well under v5e/v6e 128 MiB.
_VMEM_LIMIT = 48 * 1024 * 1024


def _round_up(x, m):
    return (x + m - 1) // m * m


def _pick_tile(n_pad, target):
    """Largest multiple of 128 <= target that divides n_pad (n_pad % 128 == 0)."""
    t = max(LANE, (min(target, n_pad) // LANE) * LANE)
    while n_pad % t:
        t -= LANE
    return t


# ----------------------------------------------------------------------------
# Kernel 1: fused GCN layer   out = act((adj @ x) @ W + b)
#   grid = (rows, k);  acc[tm, F] accumulates adj_tile @ x_tile over k;
#   at k == last the weight matmul + bias + activation run and the lane-dense
#   [tm, H_out] tile is stored.
# ----------------------------------------------------------------------------
def _gcn_layer_kernel(adj_ref, x_ref, w_ref, b_ref, o_ref, acc_ref, *, apply_relu):
    k = pl.program_id(1)

    @pl.when(k == 0)
    def _():
        acc_ref[...] = jnp.zeros_like(acc_ref)

    # bf16 inputs on the MXU, f32 accumulation.
    acc_ref[...] += jnp.dot(adj_ref[...], x_ref[...],
                            preferred_element_type=jnp.float32)

    @pl.when(k == pl.num_programs(1) - 1)
    def _():
        y = jnp.dot(acc_ref[...].astype(jnp.bfloat16), w_ref[...],
                    preferred_element_type=jnp.float32)
        y = y + b_ref[...]
        if apply_relu:
            y = jnp.maximum(y, 0.0)
        o_ref[...] = y.astype(o_ref.dtype)


def gcn_layer(adj, x, w, b, *, relu, out_dtype=jnp.float32,
              tile_m=256, tile_k=512):
    n = adj.shape[0]
    fp = x.shape[1]
    ho = w.shape[1]
    tm = _pick_tile(n, tile_m)
    tk = _pick_tile(n, tile_k)
    return pl.pallas_call(
        functools.partial(_gcn_layer_kernel, apply_relu=relu),
        out_shape=jax.ShapeDtypeStruct((n, ho), out_dtype),
        grid=(n // tm, n // tk),
        in_specs=[
            pl.BlockSpec((tm, tk), lambda i, k: (i, k)),   # adj tile (bf16)
            pl.BlockSpec((tk, fp), lambda i, k: (k, 0)),   # x tile   (bf16)
            pl.BlockSpec((fp, ho), lambda i, k: (0, 0)),   # W (resident)
            pl.BlockSpec((1, ho), lambda i, k: (0, 0)),    # bias
        ],
        out_specs=pl.BlockSpec((tm, ho), lambda i, k: (i, 0)),
        scratch_shapes=[pltpu.VMEM((tm, fp), jnp.float32)],
        compiler_params=pltpu.CompilerParams(
            dimension_semantics=("parallel", "arbitrary"),
            vmem_limit_bytes=_VMEM_LIMIT,
        ),
    )(adj, x, w, b)


# ----------------------------------------------------------------------------
# Kernel 2: predictor = Linear -> BatchNorm1d(training stats) -> PReLU -> Dropout
#   grid = (views,); weights / h are resident across views, the pre-drawn
#   dropout uniforms and the output are blocked per view.  BatchNorm stats are
#   computed per view over the n_valid real rows only (rows are zero-padded).
# ----------------------------------------------------------------------------
def _predictor_kernel(h_ref, w_ref, b_ref, gamma_ref, beta_ref, a_ref, u_ref,
                      o_ref, *, n_valid, dropout_p, training):
    # Linear (bf16 MXU, f32 accumulate)
    y = jnp.dot(h_ref[...].astype(jnp.bfloat16), w_ref[...],
                preferred_element_type=jnp.float32) + b_ref[...]

    # BatchNorm1d, training mode: masked batch statistics (biased var, eps=1e-5)
    rows = lax.broadcasted_iota(jnp.int32, y.shape, 0)
    mask = (rows < n_valid).astype(jnp.float32)
    inv_n = 1.0 / float(n_valid)
    mean = jnp.sum(y * mask, axis=0, keepdims=True) * inv_n
    diff = (y - mean) * mask
    var = jnp.sum(diff * diff, axis=0, keepdims=True) * inv_n
    y = (y - mean) * lax.rsqrt(var + 1e-5)
    y = y * gamma_ref[...] + beta_ref[...]

    # PReLU (single learned slope, read from SMEM)
    a = a_ref[0]
    y = jnp.where(y > 0.0, y, a * y)

    # Dropout (training semantics) from pre-drawn per-view uniforms
    if training and dropout_p > 0.0:
        keep = u_ref[0] >= dropout_p
        y = jnp.where(keep, y * (1.0 / (1.0 - dropout_p)), 0.0)

    o_ref[0] = y


def predictor(h, w, b, gamma, beta, a, uniforms, *, n_valid, dropout_p,
              training=True):
    npad, hp = h.shape
    views = uniforms.shape[0]
    return pl.pallas_call(
        functools.partial(_predictor_kernel, n_valid=n_valid,
                          dropout_p=dropout_p, training=training),
        out_shape=jax.ShapeDtypeStruct((views, npad, hp), jnp.float32),
        grid=(views,),
        in_specs=[
            pl.BlockSpec((npad, hp), lambda v: (0, 0)),        # h (shared)
            pl.BlockSpec((hp, hp), lambda v: (0, 0)),          # W (shared)
            pl.BlockSpec((1, hp), lambda v: (0, 0)),           # bias
            pl.BlockSpec((1, hp), lambda v: (0, 0)),           # gamma
            pl.BlockSpec((1, hp), lambda v: (0, 0)),           # beta
            pl.BlockSpec(memory_space=pltpu.MemorySpace.SMEM),  # PReLU slope
            pl.BlockSpec((1, npad, hp), lambda v: (v, 0, 0)),  # uniforms / view
        ],
        out_specs=pl.BlockSpec((1, npad, hp), lambda v: (v, 0, 0)),
        compiler_params=pltpu.CompilerParams(
            dimension_semantics=("parallel",),
            vmem_limit_bytes=_VMEM_LIMIT,
        ),
    )(h, w, b, gamma, beta, a, uniforms)


# ----------------------------------------------------------------------------
# Kernel 3: global_add_pool — gridded segment-sum over node tiles.
#   Output [Gp, Hp] stays resident across the (arbitrary) node-tile axis;
#   padded nodes carry graph id -1 and match no graph.
# ----------------------------------------------------------------------------
def _pool_kernel(batch_ref, h_ref, o_ref):
    @pl.when(pl.program_id(0) == 0)
    def _():
        o_ref[...] = jnp.zeros_like(o_ref)

    g = o_ref.shape[0]
    tm = h_ref.shape[0]
    gids = lax.broadcasted_iota(jnp.int32, (g, tm), 0)           # [Gp, tm]
    onehot = (batch_ref[...] == gids).astype(jnp.float32)        # (1,tm) vs (Gp,tm)
    o_ref[...] += jnp.dot(onehot, h_ref[...],
                          preferred_element_type=jnp.float32)


def global_add_pool(h, batch_row, num_graphs_padded, *, tile_m=512):
    npad, hp = h.shape
    tm = _pick_tile(npad, tile_m)
    return pl.pallas_call(
        _pool_kernel,
        out_shape=jax.ShapeDtypeStruct((num_graphs_padded, hp), jnp.float32),
        grid=(npad // tm,),
        in_specs=[
            pl.BlockSpec((1, tm), lambda i: (0, i)),
            pl.BlockSpec((tm, hp), lambda i: (i, 0)),
        ],
        out_specs=pl.BlockSpec((num_graphs_padded, hp), lambda i: (0, 0)),
        compiler_params=pltpu.CompilerParams(
            dimension_semantics=("arbitrary",),
            vmem_limit_bytes=_VMEM_LIMIT,
        ),
    )(batch_row, h)


# ----------------------------------------------------------------------------
# Parameters (deterministic init) and forward glue
# ----------------------------------------------------------------------------
def init_params(key, in_dim, hidden_dim):
    ks = jax.random.split(key, 3)
    s = 0.1
    return {
        # GCN stand-in encoder
        "w1": jax.random.normal(ks[0], (in_dim, hidden_dim), jnp.float32) * s,
        "b1": jnp.zeros((hidden_dim,), jnp.float32),
        "w2": jax.random.normal(ks[1], (hidden_dim, hidden_dim), jnp.float32) * s,
        "b2": jnp.zeros((hidden_dim,), jnp.float32),
        # predictor: Linear(hidden, hidden) + BatchNorm1d + PReLU
        "pred_w": jax.random.normal(ks[2], (hidden_dim, hidden_dim), jnp.float32) * s,
        "pred_b": jnp.zeros((hidden_dim,), jnp.float32),
        "bn_gamma": jnp.ones((hidden_dim,), jnp.float32),
        "bn_beta": jnp.zeros((hidden_dim,), jnp.float32),
        "prelu_a": jnp.full((1,), 0.25, jnp.float32),
    }


def encoder_forward(params, target_params, x, edge_index, edge_weight, batch,
                    num_graphs, dropout=0.2, training=True, dropout_key=None):
    # TODO(synk): augmentor is an external ctor arg; identity augmentations are
    # used, so view 1 / view 2 share x and adj and the GNN passes are reused.
    n, f = x.shape
    h = params["w1"].shape[1]

    n_pad = _round_up(max(n, SUBLANE), LANE)
    f_pad = _round_up(f, LANE)
    h_pad = _round_up(h, LANE)
    g_pad = _round_up(max(num_graphs, 1), SUBLANE)

    if edge_weight is None:
        edge_weight = jnp.ones((edge_index.shape[1],), jnp.float32)

    # ---- dense adjacency with self loops (built once, shared everywhere) ----
    # TODO(synk): O(N^2) dense scatter build; replace with a blocked-sparse /
    # scalar-prefetch SpMM path for large sparse graphs.
    adj = jnp.zeros((n, n), jnp.float32)
    adj = adj.at[edge_index[0], edge_index[1]].add(edge_weight)
    adj = adj + jnp.eye(n, dtype=jnp.float32)
    adj_p = jnp.pad(adj, ((0, n_pad - n), (0, n_pad - n))).astype(jnp.bfloat16)
    x_p = jnp.pad(x, ((0, n_pad - n), (0, f_pad - f))).astype(jnp.bfloat16)

    def pad2(w, r, c):
        return jnp.pad(w, ((0, r - w.shape[0]), (0, c - w.shape[1])))

    def pad1(v, c, fill=0.0):
        return jnp.pad(v, (0, c - v.shape[0]), constant_values=fill)

    # Stack online + target weights along the lane dim (adj streamed once/layer).
    w1_cat = jnp.concatenate(
        [pad2(params["w1"], f_pad, h_pad),
         pad2(target_params["w1"], f_pad, h_pad)], axis=1).astype(jnp.bfloat16)
    b1_cat = jnp.concatenate(
        [pad1(params["b1"], h_pad), pad1(target_params["b1"], h_pad)]
    )[None, :].astype(jnp.float32)

    zeros_h = jnp.zeros((h_pad, h_pad), jnp.float32)
    w2_bd = jnp.block(
        [[pad2(params["w2"], h_pad, h_pad), zeros_h],
         [zeros_h, pad2(target_params["w2"], h_pad, h_pad)]]).astype(jnp.bfloat16)
    b2_cat = jnp.concatenate(
        [pad1(params["b2"], h_pad), pad1(target_params["b2"], h_pad)]
    )[None, :].astype(jnp.float32)

    # ---- 2-layer GCN stand-in encoder, online + target fused ----
    z1_cat = gcn_layer(adj_p, x_p, w1_cat, b1_cat, relu=True,
                       out_dtype=jnp.bfloat16)
    z2_cat = gcn_layer(adj_p, z1_cat, w2_bd, b2_cat, relu=False,
                       out_dtype=jnp.float32)

    h_online = z2_cat[:, :h_pad]
    h_target = lax.stop_gradient(z2_cat[:, h_pad:])   # target encoder: no grad

    # ---- global_add_pool over online embeddings ----
    batch_row = jnp.full((1, n_pad), -1, jnp.int32).at[0, :n].set(
        batch.astype(jnp.int32))
    g_pool = global_add_pool(h_online, batch_row, g_pad)

    # ---- predictor (both views in one call, independent dropout draws) ----
    if dropout_key is None:
        dropout_key = jax.random.PRNGKey(0)
    uniforms = jax.random.uniform(dropout_key, (2, n_pad, h_pad), jnp.float32)
    pred_w = pad2(params["pred_w"], h_pad, h_pad).astype(jnp.bfloat16)
    pred_b = pad1(params["pred_b"], h_pad)[None, :].astype(jnp.float32)
    gamma = pad1(params["bn_gamma"], h_pad, 1.0)[None, :].astype(jnp.float32)
    beta = pad1(params["bn_beta"], h_pad)[None, :].astype(jnp.float32)
    preds = predictor(h_online, pred_w, pred_b, gamma, beta,
                      params["prelu_a"], uniforms,
                      n_valid=n, dropout_p=dropout, training=training)

    # ---- slice back to logical shapes ----
    g1 = g_pool[:num_graphs, :h]
    g2 = g1                           # identity augmentation -> identical view
    h1_pred = preds[0, :n, :h]
    h2_pred = preds[1, :n, :h]
    h1_target = h_target[:n, :h]
    h2_target = h1_target
    return g1, g2, h1_pred, h2_pred, h1_target, h2_target


encoder_forward_jit = jax.jit(
    encoder_forward, static_argnames=("num_graphs", "dropout", "training"))


if __name__ == "__main__":
    key = jax.random.PRNGKey(0)
    N, F, H, E, G = 16, 8, 32, 40, 2  # nodes, in-feats, hidden_dim, edges, graphs

    k_x, k_e, k_p, k_d = jax.random.split(key, 4)
    x = jax.random.normal(k_x, (N, F), jnp.float32)
    src = jax.random.randint(k_e, (E,), 0, N)
    dst = jnp.roll(src, 1)
    edge_index = jnp.stack([src, dst]).astype(jnp.int32)      # [2, E]
    edge_weight = jnp.ones((E,), jnp.float32)
    batch = jnp.concatenate([jnp.zeros(N // 2, jnp.int32),
                             jnp.ones(N // 2, jnp.int32)])    # [N]

    params = init_params(k_p, F, H)
    # get_target_encoder(): deepcopy of the online encoder parameters
    target_params = jax.tree_util.tree_map(lambda v: v, params)

    outs = encoder_forward_jit(params, target_params, x, edge_index,
                               edge_weight, batch, num_graphs=G, dropout=0.2,
                               training=True, dropout_key=k_d)
    outs = jax.block_until_ready(outs)

    g1, g2, h1_pred, h2_pred, h1_target, h2_target = outs
    assert g1.shape == (G, H) and g2.shape == (G, H)
    assert h1_pred.shape == (N, H) and h2_pred.shape == (N, H)
    assert h1_target.shape == (N, H) and h2_target.shape == (N, H)
    assert all(bool(jnp.all(jnp.isfinite(o))) for o in outs)
    print("KERNEL_OK")
</pallas_src>

<mosaic_0001>
module attributes {stable_mosaic.version = 11 : i64} {
  func.func private @main(%arg0: i32) attributes {dimension_semantics = [#tpu.dimension_semantics<core_parallel>], iteration_bounds = array<i64: 2>, tpu.core_type = #tpu.core_type<sc_scalar_subcore>, window_params = []} {
    return
  }
}

module attributes {stable_mosaic.version = 11 : i64} {
  func.func private @main(%arg0: i32) attributes {dimension_semantics = [#tpu.dimension_semantics<core_parallel>], iteration_bounds = array<i64: 2>, tpu.core_type = #tpu.core_type<sc_scalar_subcore>, window_params = []} {
    return
  }
}

module attributes {stable_mosaic.version = 11 : i64} {
  func.func @_gcn_layer_kernel(%arg0: i32, %arg1: i32, %arg2: memref<128x128xbf16, #tpu.memory_space<vmem>>, %arg3: memref<128x128xbf16, #tpu.memory_space<vmem>>, %arg4: memref<128x256xbf16, #tpu.memory_space<vmem>>, %arg5: memref<1x256xf32, #tpu.memory_space<vmem>>, %arg6: memref<128x256xbf16, #tpu.memory_space<vmem>>, %arg7: memref<128x128xf32, #tpu.memory_space<vmem>>) attributes {dimension_semantics = [#tpu.dimension_semantics<parallel>, #tpu.dimension_semantics<arbitrary>], iteration_bounds = array<i64: 1, 1>, scalar_prefetch = 0 : i64, scratch_operands = 1 : i64, tpu.core_type = #tpu.core_type<tc>, window_params = [{transform_indices = @transform_0, window_bounds = array<i64: 128, 128>}, {transform_indices = @transform_1, window_bounds = array<i64: 128, 128>}, {pipeline_mode = #tpu.pipeline_mode<synchronous>, transform_indices = @transform_2, window_bounds = array<i64: 128, 256>}, {pipeline_mode = #tpu.pipeline_mode<synchronous>, transform_indices = @transform_3, window_bounds = array<i64: 1, 256>}, {transform_indices = @transform_4, window_bounds = array<i64: 128, 256>}]} {
    %c0_i32 = arith.constant 0 : i32
    %0 = arith.cmpi eq, %arg1, %c0_i32 : i32
    %1 = arith.extui %0 : i1 to i32
    %c0_i32_0 = arith.constant 0 : i32
    %2 = arith.cmpi ne, %1, %c0_i32_0 : i32
    scf.if %2 {
      %cst_10 = arith.constant 0.000000e+00 : f32
      %12 = vector.broadcast %cst_10 : f32 to vector<128x128xf32>
      %c0_11 = arith.constant 0 : index
      %c0_12 = arith.constant 0 : index
      %13 = vector.load %arg7[%c0_11, %c0_12] : memref<128x128xf32, #tpu.memory_space<vmem>>, vector<128x128xf32>
      tpu.vector_store %arg7[%c0_11, %c0_12], %12 {strides = array<i32>} : memref<128x128xf32, #tpu.memory_space<vmem>>, vector<128x128xf32>,
    } else {
    }
    %c0 = arith.constant 0 : index
    %c0_1 = arith.constant 0 : index
    %3 = vector.load %arg7[%c0, %c0_1] : memref<128x128xf32, #tpu.memory_space<vmem>>, vector<128x128xf32>
    %c0_2 = arith.constant 0 : index
    %c0_3 = arith.constant 0 : index
    %4 = vector.load %arg2[%c0_2, %c0_3] : memref<128x128xbf16, #tpu.memory_space<vmem>>, vector<128x128xbf16>
    %c0_4 = arith.constant 0 : index
    %c0_5 = arith.constant 0 : index
    %5 = vector.load %arg3[%c0_4, %c0_5] : memref<128x128xbf16, #tpu.memory_space<vmem>>, vector<128x128xbf16>
    %cst = arith.constant dense<0.000000e+00> : vector<128x128xf32>
    %6 = tpu.matmul %4, %5, %cst {dimension_numbers = #tpu.dot_dimension_numbers<[1], [0], [0], [1], [0, 0, 1, 1], [], []>} : vector<128x128xbf16>, vector<128x128xbf16>, vector<128x128xf32> -> vector<128x128xf32>
    %7 = arith.addf %3, %6 : vector<128x128xf32>
    %c0_6 = arith.constant 0 : index
    %c0_7 = arith.constant 0 : index
    %8 = vector.load %arg7[%c0_6, %c0_7] : memref<128x128xf32, #tpu.memory_space<vmem>>, vector<128x128xf32>
    tpu.vector_store %arg7[%c0_6, %c0_7], %7 {strides = array<i32>} : memref<128x128xf32, #tpu.memory_space<vmem>>, vector<128x128xf32>,
    %c0_i32_8 = arith.constant 0 : i32
    %9 = arith.cmpi eq, %arg1, %c0_i32_8 : i32
    %10 = arith.extui %9 : i1 to i32
    %c0_i32_9 = arith.constant 0 : i32
    %11 = arith.cmpi ne, %10, %c0_i32_9 : i32
    scf.if %11 {
      %c0_10 = arith.constant 0 : index
      %c0_11 = arith.constant 0 : index
      %12 = vector.load %arg7[%c0_10, %c0_11] : memref<128x128xf32, #tpu.memory_space<vmem>>, vector<128x128xf32>
      %13 = arith.truncf %12 : vector<128x128xf32> to vector<128x128xbf16>
      %c0_12 = arith.constant 0 : index
      %c0_13 = arith.constant 0 : index
      %14 = vector.load %arg4[%c0_12, %c0_13] : memref<128x256xbf16, #tpu.memory_space<vmem>>, vector<128x256xbf16>
      %cst_14 = arith.constant dense<0.000000e+00> : vector<128x256xf32>
      %15 = tpu.matmul %13, %14, %cst_14 {dimension_numbers = #tpu.dot_dimension_numbers<[1], [0], [0], [1], [0, 0, 1, 1], [], []>} : vector<128x128xbf16>, vector<128x256xbf16>, vector<128x256xf32> -> vector<128x256xf32>
      %c0_15 = arith.constant 0 : index
      %c0_16 = arith.constant 0 : index
      %16 = vector.load %arg5[%c0_15, %c0_16] : memref<1x256xf32, #tpu.memory_space<vmem>>, vector<1x256xf32>
      %17 = vector.broadcast %16 : vector<1x256xf32> to vector<128x256xf32>
      %18 = arith.addf %15, %17 : vector<128x256xf32>
      %cst_17 = arith.constant 0.000000e+00 : f32
      %19 = vector.broadcast %cst_17 : f32 to vector<128x256xf32>
      %20 = arith.maximumf %18, %19 : vector<128x256xf32>
      %21 = arith.truncf %20 : vector<128x256xf32> to vector<128x256xbf16>
      %c0_18 = arith.constant 0 : index
      %c0_19 = arith.constant 0 : index
      %22 = vector.load %arg6[%c0_18, %c0_19] : memref<128x256xbf16, #tpu.memory_space<vmem>>, vector<128x256xbf16>
      tpu.vector_store %arg6[%c0_18, %c0_19], %21 {strides = array<i32>} : memref<128x256xbf16, #tpu.memory_space<vmem>>, vector<128x256xbf16>,
    } else {
    }
    return
  }
  func.func @transform_0(%arg0: i32, %arg1: i32) -> (i32, i32) {
    %c0_i32 = arith.constant 0 : i32
    return %arg0, %arg1 : i32, i32
  }
  func.func @transform_1(%arg0: i32, %arg1: i32) -> (i32, i32) {
    %c0_i32 = arith.constant 0 : i32
    %c0_i32_0 = arith.constant 0 : i32
    return %arg1, %c0_i32 : i32, i32
  }
  func.func @transform_2(%arg0: i32, %arg1: i32) -> (i32, i32) {
    %c0_i32 = arith.constant 0 : i32
    %c0_i32_0 = arith.constant 0 : i32
    %c0_i32_1 = arith.constant 0 : i32
    return %c0_i32, %c0_i32_0 : i32, i32
  }
  func.func @transform_3(%arg0: i32, %arg1: i32) -> (i32, i32) {
    %c0_i32 = arith.constant 0 : i32
    %c0_i32_0 = arith.constant 0 : i32
    %c0_i32_1 = arith.constant 0 : i32
    return %c0_i32, %c0_i32_0 : i32, i32
  }
  func.func @transform_4(%arg0: i32, %arg1: i32) -> (i32, i32) {
    %c0_i32 = arith.constant 0 : i32
    %c0_i32_0 = arith.constant 0 : i32
    return %arg0, %c0_i32 : i32, i32
  }
}

module attributes {stable_mosaic.version = 11 : i64} {
  func.func @_gcn_layer_kernel(%arg0: i32, %arg1: i32, %arg2: memref<128x128xbf16, #tpu.memory_space<vmem>>, %arg3: memref<128x256xbf16, #tpu.memory_space<vmem>>, %arg4: memref<256x256xbf16, #tpu.memory_space<vmem>>, %arg5: memref<1x256xf32, #tpu.memory_space<vmem>>, %arg6: memref<128x256xf32, #tpu.memory_space<vmem>>, %arg7: memref<128x256xf32, #tpu.memory_space<vmem>>) attributes {dimension_semantics = [#tpu.dimension_semantics<parallel>, #tpu.dimension_semantics<arbitrary>], iteration_bounds = array<i64: 1, 1>, scalar_prefetch = 0 : i64, scratch_operands = 1 : i64, tpu.core_type = #tpu.core_type<tc>, window_params = [{transform_indices = @transform_0, window_bounds = array<i64: 128, 128>}, {transform_indices = @transform_1, window_bounds = array<i64: 128, 256>}, {pipeline_mode = #tpu.pipeline_mode<synchronous>, transform_indices = @transform_2, window_bounds = array<i64: 256, 256>}, {pipeline_mode = #tpu.pipeline_mode<synchronous>, transform_indices = @transform_3, window_bounds = array<i64: 1, 256>}, {transform_indices = @transform_4, window_bounds = array<i64: 128, 256>}]} {
    %c0_i32 = arith.constant 0 : i32
    %0 = arith.cmpi eq, %arg1, %c0_i32 : i32
    %1 = arith.extui %0 : i1 to i32
    %c0_i32_0 = arith.constant 0 : i32
    %2 = arith.cmpi ne, %1, %c0_i32_0 : i32
    scf.if %2 {
      %cst_10 = arith.constant 0.000000e+00 : f32
      %12 = vector.broadcast %cst_10 : f32 to vector<128x256xf32>
      %c0_11 = arith.constant 0 : index
      %c0_12 = arith.constant 0 : index
      %13 = vector.load %arg7[%c0_11, %c0_12] : memref<128x256xf32, #tpu.memory_space<vmem>>, vector<128x256xf32>
      tpu.vector_store %arg7[%c0_11, %c0_12], %12 {strides = array<i32>} : memref<128x256xf32, #tpu.memory_space<vmem>>, vector<128x256xf32>,
    } else {
    }
    %c0 = arith.constant 0 : index
    %c0_1 = arith.constant 0 : index
    %3 = vector.load %arg7[%c0, %c0_1] : memref<128x256xf32, #tpu.memory_space<vmem>>, vector<128x256xf32>
    %c0_2 = arith.constant 0 : index
    %c0_3 = arith.constant 0 : index
    %4 = vector.load %arg2[%c0_2, %c0_3] : memref<128x128xbf16, #tpu.memory_space<vmem>>, vector<128x128xbf16>
    %c0_4 = arith.constant 0 : index
    %c0_5 = arith.constant 0 : index
    %5 = vector.load %arg3[%c0_4, %c0_5] : memref<128x256xbf16, #tpu.memory_space<vmem>>, vector<128x256xbf16>
    %cst = arith.constant dense<0.000000e+00> : vector<128x256xf32>
    %6 = tpu.matmul %4, %5, %cst {dimension_numbers = #tpu.dot_dimension_numbers<[1], [0], [0], [1], [0, 0, 1, 1], [], []>} : vector<128x128xbf16>, vector<128x256xbf16>, vector<128x256xf32> -> vector<128x256xf32>
    %7 = arith.addf %3, %6 : vector<128x256xf32>
    %c0_6 = arith.constant 0 : index
    %c0_7 = arith.constant 0 : index
    %8 = vector.load %arg7[%c0_6, %c0_7] : memref<128x256xf32, #tpu.memory_space<vmem>>, vector<128x256xf32>
    tpu.vector_store %arg7[%c0_6, %c0_7], %7 {strides = array<i32>} : memref<128x256xf32, #tpu.memory_space<vmem>>, vector<128x256xf32>,
    %c0_i32_8 = arith.constant 0 : i32
    %9 = arith.cmpi eq, %arg1, %c0_i32_8 : i32
    %10 = arith.extui %9 : i1 to i32
    %c0_i32_9 = arith.constant 0 : i32
    %11 = arith.cmpi ne, %10, %c0_i32_9 : i32
    scf.if %11 {
      %c0_10 = arith.constant 0 : index
      %c0_11 = arith.constant 0 : index
      %12 = vector.load %arg7[%c0_10, %c0_11] : memref<128x256xf32, #tpu.memory_space<vmem>>, vector<128x256xf32>
      %13 = arith.truncf %12 : vector<128x256xf32> to vector<128x256xbf16>
      %c0_12 = arith.constant 0 : index
      %c0_13 = arith.constant 0 : index
      %14 = vector.load %arg4[%c0_12, %c0_13] : memref<256x256xbf16, #tpu.memory_space<vmem>>, vector<256x256xbf16>
      %cst_14 = arith.constant dense<0.000000e+00> : vector<128x256xf32>
      %15 = tpu.matmul %13, %14, %cst_14 {dimension_numbers = #tpu.dot_dimension_numbers<[1], [0], [0], [1], [0, 0, 1, 1], [], []>} : vector<128x256xbf16>, vector<256x256xbf16>, vector<128x256xf32> -> vector<128x256xf32>
      %c0_15 = arith.constant 0 : index
      %c0_16 = arith.constant 0 : index
      %16 = vector.load %arg5[%c0_15, %c0_16] : memref<1x256xf32, #tpu.memory_space<vmem>>, vector<1x256xf32>
      %17 = vector.broadcast %16 : vector<1x256xf32> to vector<128x256xf32>
      %18 = arith.addf %15, %17 : vector<128x256xf32>
      %c0_17 = arith.constant 0 : index
      %c0_18 = arith.constant 0 : index
      %19 = vector.load %arg6[%c0_17, %c0_18] : memref<128x256xf32, #tpu.memory_space<vmem>>, vector<128x256xf32>
      tpu.vector_store %arg6[%c0_17, %c0_18], %18 {strides = array<i32>} : memref<128x256xf32, #tpu.memory_space<vmem>>, vector<128x256xf32>,
    } else {
    }
    return
  }
  func.func @transform_0(%arg0: i32, %arg1: i32) -> (i32, i32) {
    %c0_i32 = arith.constant 0 : i32
    return %arg0, %arg1 : i32, i32
  }
  func.func @transform_1(%arg0: i32, %arg1: i32) -> (i32, i32) {
    %c0_i32 = arith.constant 0 : i32
    %c0_i32_0 = arith.constant 0 : i32
    return %arg1, %c0_i32 : i32, i32
  }
  func.func @transform_2(%arg0: i32, %arg1: i32) -> (i32, i32) {
    %c0_i32 = arith.constant 0 : i32
    %c0_i32_0 = arith.constant 0 : i32
    %c0_i32_1 = arith.constant 0 : i32
    return %c0_i32, %c0_i32_0 : i32, i32
  }
  func.func @transform_3(%arg0: i32, %arg1: i32) -> (i32, i32) {
    %c0_i32 = arith.constant 0 : i32
    %c0_i32_0 = arith.constant 0 : i32
    %c0_i32_1 = arith.constant 0 : i32
    return %c0_i32, %c0_i32_0 : i32, i32
  }
  func.func @transform_4(%arg0: i32, %arg1: i32) -> (i32, i32) {
    %c0_i32 = arith.constant 0 : i32
    %c0_i32_0 = arith.constant 0 : i32
    return %arg0, %c0_i32 : i32, i32
  }
}

module attributes {stable_mosaic.version = 11 : i64} {
  func.func @_pool_kernel(%arg0: i32, %arg1: memref<1x128xi32, #tpu.memory_space<vmem>>, %arg2: memref<128x128xf32, #tpu.memory_space<vmem>>, %arg3: memref<8x128xf32, #tpu.memory_space<vmem>>) attributes {dimension_semantics = [#tpu.dimension_semantics<arbitrary>], iteration_bounds = array<i64: 1>, scalar_prefetch = 0 : i64, scratch_operands = 0 : i64, tpu.core_type = #tpu.core_type<tc>, window_params = [{transform_indices = @transform_0, window_bounds = array<i64: 1, 128>}, {transform_indices = @transform_1, window_bounds = array<i64: 128, 128>}, {pipeline_mode = #tpu.pipeline_mode<synchronous>, transform_indices = @transform_2, window_bounds = array<i64: 8, 128>}]} {
    %c0_i32 = arith.constant 0 : i32
    %0 = arith.cmpi eq, %arg0, %c0_i32 : i32
    %1 = arith.extui %0 : i1 to i32
    %c0_i32_0 = arith.constant 0 : i32
    %2 = arith.cmpi ne, %1, %c0_i32_0 : i32
    scf.if %2 {
      %cst_8 = arith.constant 0.000000e+00 : f32
      %14 = vector.broadcast %cst_8 : f32 to vector<8x128xf32>
      %c0_9 = arith.constant 0 : index
      %c0_10 = arith.constant 0 : index
      %15 = vector.load %arg3[%c0_9, %c0_10] : memref<8x128xf32, #tpu.memory_space<vmem>>, vector<8x128xf32>
      tpu.vector_store %arg3[%c0_9, %c0_10], %14 {strides = array<i32>} : memref<8x128xf32, #tpu.memory_space<vmem>>, vector<8x128xf32>,
    } else {
    }
    %3 = tpu.iota {dimensions = array<i32: 0>} : vector<8x128xi32>
    %c0 = arith.constant 0 : index
    %c0_1 = arith.constant 0 : index
    %4 = vector.load %arg1[%c0, %c0_1] : memref<1x128xi32, #tpu.memory_space<vmem>>, vector<1x128xi32>
    %5 = vector.broadcast %4 : vector<1x128xi32> to vector<8x128xi32>
    %6 = arith.cmpi eq, %5, %3 : vector<8x128xi32>
    %7 = arith.extui %6 : vector<8x128xi1> to vector<8x128xi32>
    %8 = arith.sitofp %7 : vector<8x128xi32> to vector<8x128xf32>
    %c0_2 = arith.constant 0 : index
    %c0_3 = arith.constant 0 : index
    %9 = vector.load %arg3[%c0_2, %c0_3] : memref<8x128xf32, #tpu.memory_space<vmem>>, vector<8x128xf32>
    %c0_4 = arith.constant 0 : index
    %c0_5 = arith.constant 0 : index
    %10 = vector.load %arg2[%c0_4, %c0_5] : memref<128x128xf32, #tpu.memory_space<vmem>>, vector<128x128xf32>
    %cst = arith.constant dense<0.000000e+00> : vector<8x128xf32>
    %11 = tpu.matmul %8, %10, %cst {dimension_numbers = #tpu.dot_dimension_numbers<[1], [0], [0], [1], [0, 0, 1, 1], [], []>} : vector<8x128xf32>, vector<128x128xf32>, vector<8x128xf32> -> vector<8x128xf32>
    %12 = arith.addf %9, %11 : vector<8x128xf32>
    %c0_6 = arith.constant 0 : index
    %c0_7 = arith.constant 0 : index
    %13 = vector.load %arg3[%c0_6, %c0_7] : memref<8x128xf32, #tpu.memory_space<vmem>>, vector<8x128xf32>
    tpu.vector_store %arg3[%c0_6, %c0_7], %12 {strides = array<i32>} : memref<8x128xf32, #tpu.memory_space<vmem>>, vector<8x128xf32>,
    return
  }
  func.func @transform_0(%arg0: i32) -> (i32, i32) {
    %c0_i32 = arith.constant 0 : i32
    %c0_i32_0 = arith.constant 0 : i32
    return %c0_i32, %arg0 : i32, i32
  }
  func.func @transform_1(%arg0: i32) -> (i32, i32) {
    %c0_i32 = arith.constant 0 : i32
    %c0_i32_0 = arith.constant 0 : i32
    return %arg0, %c0_i32 : i32, i32
  }
  func.func @transform_2(%arg0: i32) -> (i32, i32) {
    %c0_i32 = arith.constant 0 : i32
    %c0_i32_0 = arith.constant 0 : i32
    %c0_i32_1 = arith.constant 0 : i32
    return %c0_i32, %c0_i32_0 : i32, i32
  }
}

module attributes {stable_mosaic.version = 11 : i64} {
  func.func @_predictor_kernel(%arg0: i32, %arg1: memref<128x128xf32, #tpu.memory_space<vmem>>, %arg2: memref<128x128xbf16, #tpu.memory_space<vmem>>, %arg3: memref<1x128xf32, #tpu.memory_space<vmem>>, %arg4: memref<1x128xf32, #tpu.memory_space<vmem>>, %arg5: memref<1x128xf32, #tpu.memory_space<vmem>>, %arg6: memref<1xf32, #tpu.memory_space<smem>>, %arg7: memref<1x128x128xf32, #tpu.memory_space<vmem>>, %arg8: memref<1x128x128xf32, #tpu.memory_space<vmem>>) attributes {dimension_semantics = [#tpu.dimension_semantics<parallel>], iteration_bounds = array<i64: 2>, scalar_prefetch = 0 : i64, scratch_operands = 0 : i64, tpu.core_type = #tpu.core_type<tc>, window_params = [{pipeline_mode = #tpu.pipeline_mode<synchronous>, transform_indices = @transform_0, window_bounds = array<i64: 128, 128>}, {pipeline_mode = #tpu.pipeline_mode<synchronous>, transform_indices = @transform_1, window_bounds = array<i64: 128, 128>}, {pipeline_mode = #tpu.pipeline_mode<synchronous>, transform_indices = @transform_2, window_bounds = array<i64: 1, 128>}, {pipeline_mode = #tpu.pipeline_mode<synchronous>, transform_indices = @transform_3, window_bounds = array<i64: 1, 128>}, {pipeline_mode = #tpu.pipeline_mode<synchronous>, transform_indices = @transform_4, window_bounds = array<i64: 1, 128>}, {transform_indices = @transform_5, window_bounds = array<i64: 1>}, {transform_indices = @transform_6, window_bounds = array<i64: 1, 128, 128>}, {transform_indices = @transform_7, window_bounds = array<i64: 1, 128, 128>}]} {
    %c0 = arith.constant 0 : index
    %c0_0 = arith.constant 0 : index
    %0 = vector.load %arg1[%c0, %c0_0] : memref<128x128xf32, #tpu.memory_space<vmem>>, vector<128x128xf32>
    %1 = arith.truncf %0 : vector<128x128xf32> to vector<128x128xbf16>
    %c0_1 = arith.constant 0 : index
    %c0_2 = arith.constant 0 : index
    %2 = vector.load %arg2[%c0_1, %c0_2] : memref<128x128xbf16, #tpu.memory_space<vmem>>, vector<128x128xbf16>
    %cst = arith.constant dense<0.000000e+00> : vector<128x128xf32>
    %3 = tpu.matmul %1, %2, %cst {dimension_numbers = #tpu.dot_dimension_numbers<[1], [0], [0], [1], [0, 0, 1, 1], [], []>} : vector<128x128xbf16>, vector<128x128xbf16>, vector<128x128xf32> -> vector<128x128xf32>
    %c0_3 = arith.constant 0 : index
    %c0_4 = arith.constant 0 : index
    %4 = vector.load %arg3[%c0_3, %c0_4] : memref<1x128xf32, #tpu.memory_space<vmem>>, vector<1x128xf32>
    %5 = vector.broadcast %4 : vector<1x128xf32> to vector<128x128xf32>
    %6 = arith.addf %3, %5 : vector<128x128xf32>
    %7 = tpu.iota {dimensions = array<i32: 0>} : vector<128x128xi32>
    %c16_i32 = arith.constant 16 : i32
    %8 = vector.broadcast %c16_i32 : i32 to vector<128x128xi32>
    %9 = arith.cmpi slt, %7, %8 : vector<128x128xi32>
    %10 = arith.extui %9 : vector<128x128xi1> to vector<128x128xi32>
    %11 = arith.sitofp %10 : vector<128x128xi32> to vector<128x128xf32>
    %12 = arith.mulf %6, %11 : vector<128x128xf32>
    %cst_5 = arith.constant dense<0.000000e+00> : vector<128xf32>
    %13 = vector.multi_reduction <add>, %12, %cst_5 [0] : vector<128x128xf32> to vector<128xf32>
    %14 = vector.shape_cast %13 : vector<128xf32> to vector<1x128xf32>
    %cst_6 = arith.constant 6.250000e-02 : f32
    %15 = vector.broadcast %cst_6 : f32 to vector<1x128xf32>
    %16 = arith.mulf %14, %15 : vector<1x128xf32>
    %17 = vector.broadcast %16 : vector<1x128xf32> to vector<128x128xf32>
    %18 = arith.subf %6, %17 : vector<128x128xf32>
    %19 = arith.mulf %18, %11 : vector<128x128xf32>
    %20 = arith.mulf %19, %19 : vector<128x128xf32>
    %cst_7 = arith.constant dense<0.000000e+00> : vector<128xf32>
    %21 = vector.multi_reduction <add>, %20, %cst_7 [0] : vector<128x128xf32> to vector<128xf32>
    %22 = vector.shape_cast %21 : vector<128xf32> to vector<1x128xf32>
    %cst_8 = arith.constant 6.250000e-02 : f32
    %23 = vector.broadcast %cst_8 : f32 to vector<1x128xf32>
    %24 = arith.mulf %22, %23 : vector<1x128xf32>
    %25 = vector.broadcast %16 : vector<1x128xf32> to vector<128x128xf32>
    %26 = arith.subf %6, %25 : vector<128x128xf32>
    %cst_9 = arith.constant 9.99999974E-6 : f32
    %27 = vector.broadcast %cst_9 : f32 to vector<1x128xf32>
    %28 = arith.addf %24, %27 : vector<1x128xf32>
    %29 = math.rsqrt %28 : vector<1x128xf32>
    %30 = vector.broadcast %29 : vector<1x128xf32> to vector<128x128xf32>
    %31 = arith.mulf %26, %30 : vector<128x128xf32>
    %c0_10 = arith.constant 0 : index
    %c0_11 = arith.constant 0 : index
    %32 = vector.load %arg4[%c0_10, %c0_11] : memref<1x128xf32, #tpu.memory_space<vmem>>, vector<1x128xf32>
    %33 = vector.broadcast %32 : vector<1x128xf32> to vector<128x128xf32>
    %34 = arith.mulf %31, %33 : vector<128x128xf32>
    %c0_12 = arith.constant 0 : index
    %c0_13 = arith.constant 0 : index
    %35 = vector.load %arg5[%c0_12, %c0_13] : memref<1x128xf32, #tpu.memory_space<vmem>>, vector<1x128xf32>
    %36 = vector.broadcast %35 : vector<1x128xf32> to vector<128x128xf32>
    %37 = arith.addf %34, %36 : vector<128x128xf32>
    %c0_14 = arith.constant 0 : index
    %38 = memref.load %arg6[%c0_14] : memref<1xf32, #tpu.memory_space<smem>>
    %cst_15 = arith.constant 0.000000e+00 : f32
    %39 = vector.broadcast %cst_15 : f32 to vector<128x128xf32>
    %40 = arith.cmpf ogt, %37, %39 : vector<128x128xf32>
    %41 = vector.broadcast %38 : f32 to vector<128x128xf32>
    %42 = arith.mulf %41, %37 : vector<128x128xf32>
    %43 = arith.select %40, %37, %42 : vector<128x128xi1>, vector<128x128xf32>
    %c0_16 = arith.constant 0 : index
    %c0_17 = arith.constant 0 : index
    %c0_18 = arith.constant 0 : index
    %44 = vector.load %arg7[%c0_16, %c0_17, %c0_18] : memref<1x128x128xf32, #tpu.memory_space<vmem>>, vector<1x128x128xf32>
    %45 = vector.shape_cast %44 : vector<1x128x128xf32> to vector<128x128xf32>
    %cst_19 = arith.constant 2.000000e-01 : f32
    %46 = vector.broadcast %cst_19 : f32 to vector<128x128xf32>
    %47 = arith.cmpf oge, %45, %46 : vector<128x128xf32>
    %cst_20 = arith.constant 1.250000e+00 : f32
    %48 = vector.broadcast %cst_20 : f32 to vector<128x128xf32>
    %49 = arith.mulf %43, %48 : vector<128x128xf32>
    %cst_21 = arith.constant 0.000000e+00 : f32
    %50 = vector.broadcast %cst_21 : f32 to vector<128x128xf32>
    %51 = arith.select %47, %49, %50 : vector<128x128xi1>, vector<128x128xf32>
    %c0_22 = arith.constant 0 : index
    %c0_23 = arith.constant 0 : index
    %c0_24 = arith.constant 0 : index
    %52 = vector.load %arg8[%c0_22, %c0_23, %c0_24] : memref<1x128x128xf32, #tpu.memory_space<vmem>>, vector<1x128x128xf32>
    %53 = vector.shape_cast %52 : vector<1x128x128xf32> to vector<128x128xf32>
    %54 = vector.shape_cast %51 : vector<128x128xf32> to vector<1x128x128xf32>
    tpu.vector_store %arg8[%c0_22, %c0_23, %c0_24], %54 {strides = array<i32>} : memref<1x128x128xf32, #tpu.memory_space<vmem>>, vector<1x128x128xf32>,
    return
  }
  func.func @transform_0(%arg0: i32) -> (i32, i32) {
    %c0_i32 = arith.constant 0 : i32
    %c0_i32_0 = arith.constant 0 : i32
    %c0_i32_1 = arith.constant 0 : i32
    return %c0_i32, %c0_i32_0 : i32, i32
  }
  func.func @transform_1(%arg0: i32) -> (i32, i32) {
    %c0_i32 = arith.constant 0 : i32
    %c0_i32_0 = arith.constant 0 : i32
    %c0_i32_1 = arith.constant 0 : i32
    return %c0_i32, %c0_i32_0 : i32, i32
  }
  func.func @transform_2(%arg0: i32) -> (i32, i32) {
    %c0_i32 = arith.constant 0 : i32
    %c0_i32_0 = arith.constant 0 : i32
    %c0_i32_1 = arith.constant 0 : i32
    return %c0_i32, %c0_i32_0 : i32, i32
  }
  func.func @transform_3(%arg0: i32) -> (i32, i32) {
    %c0_i32 = arith.constant 0 : i32
    %c0_i32_0 = arith.constant 0 : i32
    %c0_i32_1 = arith.constant 0 : i32
    return %c0_i32, %c0_i32_0 : i32, i32
  }
  func.func @transform_4(%arg0: i32) -> (i32, i32) {
    %c0_i32 = arith.constant 0 : i32
    %c0_i32_0 = arith.constant 0 : i32
    %c0_i32_1 = arith.constant 0 : i32
    return %c0_i32, %c0_i32_0 : i32, i32
  }
  func.func @transform_5(%arg0: i32) -> i32 {
    %c0_i32 = arith.constant 0 : i32
    %c0_i32_0 = arith.constant 0 : i32
    return %c0_i32 : i32
  }
  func.func @transform_6(%arg0: i32) -> (i32, i32, i32) {
    %c0_i32 = arith.constant 0 : i32
    %c0_i32_0 = arith.constant 0 : i32
    %c0_i32_1 = arith.constant 0 : i32
    return %arg0, %c0_i32, %c0_i32_0 : i32, i32, i32
  }
  func.func @transform_7(%arg0: i32) -> (i32, i32, i32) {
    %c0_i32 = arith.constant 0 : i32
    %c0_i32_0 = arith.constant 0 : i32
    %c0_i32_1 = arith.constant 0 : i32
    return %arg0, %c0_i32, %c0_i32_0 : i32, i32, i32
  }
}

</mosaic_0001>

<bundles_post_ra>
// kernel: encoder_forward.6
= control target key start
LH: loop header
LB: loop body
LE: loop exit
PB: predicated region body
PF: predicated region fallthrough
CT: control target
= control target key end

     0   :  { %v177_v0 = vmov 0.0   ;;  %vm178_vm0 = vmmov 0   ;;  %v16_v13 = vlaneseq  ;;  %v179_v20 = vmov 1.0   ;;  %s249_s1 = inlined_call_operand.vmem [shape: f32[128,128], index: 1, kind: input, shape index: {}]   ;;  %s250_s0 = inlined_call_operand.vmem [shape: s32[1,128], index: 0, kind: input, shape index: {}]   ;;  %s251_s2 = inlined_call_operand.vmem [shape: f32[8,128], index: 2, kind: output, shape index: {}]  }
   0x1   :  { %139 = vmatprep.subr.mxu0 %v177_v0  ;;  %v42_v1 = vld [vmem:[%s249_s1 + $0x78] sm:$0xff]  ;;  %v41_v2 = vld [vmem:[%s249_s1 + $0x70] sm:$0xff]  ;;  %171 = vmatprep.mubr.msk.f32.mxu0 %vm178_vm0, %v177_v0  ;;  %v40_v3 = vld [vmem:[%s249_s1 + $0x68] sm:$0xff] }
   0x2   :  { %140 = vmatpush3.msra.mxu0 %v42_v1  ;;  %v39_v4 = vld [vmem:[%s249_s1 + $0x60] sm:$0xff]  ;;  %v38_v5 = vld [vmem:[%s249_s1 + $0x58] sm:$0xff]  ;;  %v37_v6 = vld [vmem:[%s249_s1 + $0x50] sm:$0xff]  ;;  %v17_v16 = vshrl.u32 %v16_v13, 7 }
   0x3   :  { %141 = vmatprep.subr.mxu0 %v177_v0  ;;  %v36_v7 = vld [vmem:[%s249_s1 + $0x48] sm:$0xff]  ;;  %v35_v8 = vld [vmem:[%s249_s1 + $0x40] sm:$0xff]  ;;  %v34_v9 = vld [vmem:[%s249_s1 + $0x38] sm:$0xff] }
   0x4   :  { %142 = vmatpush3.msra.mxu0 %v41_v2  ;;  %v33_v10 = vld [vmem:[%s249_s1 + $0x30] sm:$0xff]  ;;  %v32_v11 = vld [vmem:[%s249_s1 + $0x28] sm:$0xff]  ;;  %v31_v12 = vld [vmem:[%s249_s1 + $0x20] sm:$0xff] }
   0x5   :  { %143 = vmatprep.subr.mxu0 %v177_v0  ;;  %v30_v14 = vld [vmem:[%s249_s1 + $0x18] sm:$0xff]  ;;  %v29_v15 = vld [vmem:[%s249_s1 + $0x10] sm:$0xff]  ;;  %v28_v17 = vld [vmem:[%s249_s1 + $0x8] sm:$0xff] }
   0x6   :  { %144 = vmatpush3.msra.mxu0 %v40_v3  ;;  %v119_v18 = vld [vmem:[%s250_s0] ss:$0 sm:$0xff] }
   0x7   :  { %145 = vmatprep.subr.mxu0 %v177_v0  ;;  %v27_v19 = vld [vmem:[%s249_s1] sm:$0xff]  ;;  %vm23_vm1 = vcmp.eq.s32.totalorder %v119_v18, %v17_v16 }
   0x8   :  { %146 = vmatpush3.msra.mxu0 %v39_v4 }
   0x9   :  { %147 = vmatprep.subr.mxu0 %v177_v0 }
   0xa   :  { %148 = vmatpush3.msra.mxu0 %v38_v5 }
   0xb   :  { %149 = vmatprep.subr.mxu0 %v177_v0 }
   0xc   :  { %150 = vmatpush3.msra.mxu0 %v37_v6 }
   0xd   :  { %151 = vmatprep.subr.mxu0 %v177_v0 }
   0xe   :  { %152 = vmatpush3.msra.mxu0 %v36_v7 }
   0xf   :  { %153 = vmatprep.subr.mxu0 %v177_v0 }
  0x10   :  { %154 = vmatpush3.msra.mxu0 %v35_v8 }
  0x11   :  { %155 = vmatprep.subr.mxu0 %v177_v0 }
  0x12   :  { %156 = vmatpush3.msra.mxu0 %v34_v9 }
  0x13   :  { %157 = vmatprep.subr.mxu0 %v177_v0 }
  0x14   :  { %158 = vmatpush3.msra.mxu0 %v33_v10 }
  0x15   :  { %159 = vmatprep.subr.mxu0 %v177_v0 }
  0x16   :  { %160 = vmatpush3.msra.mxu0 %v32_v11 }
  0x17   :  { %161 = vmatprep.subr.mxu0 %v177_v0 }
  0x18   :  { %162 = vmatpush3.msra.mxu0 %v31_v12 }
  0x19   :  { %163 = vmatprep.subr.mxu0 %v177_v0 }
  0x1a   :  { %164 = vmatpush3.msra.mxu0 %v30_v14 }
  0x1b   :  { %165 = vmatprep.subr.mxu0 %v177_v0 }
  0x1c   :  { %166 = vmatpush3.msra.mxu0 %v29_v15 }
  0x1d   :  { %167 = vmatprep.subr.mxu0 %v177_v0 }
  0x1e   :  { %168 = vmatpush3.msra.mxu0 %v28_v17 }
  0x1f   :  { %169 = vmatprep.subr.mxu0 %v177_v0 }
  0x20   :  { %170 = vmatpush3.msra.mxu0 %v27_v19 }
  0x21   :  { %172 = vmatmul.mubr.msk.f32.vlgmr.msra.gmra.mxu0 %vm23_vm1, %v179_v20 }
  0xe1   :  { %v109_v21 = vpop.f32.mrf.mxu0 }
  0xe2   :  { %114 = vst [vmem:[%s251_s2] sm:$0xff] %v109_v21 }
  0xe3   :  { %v173_v22 = vpop.f32.mrf.mxu0 }

// kernel: encoder_forward.4
= control target key start
LH: loop header
LB: loop body
LE: loop exit
PB: predicated region body
PF: predicated region fallthrough
CT: control target
= control target key end

     0   :  { %v876_v32 = vmov 0   ;;  %v356_v57 = vlaneseq  ;;  %s1085_s1 = inlined_call_operand.vmem [shape: bf16[128,128], index: 1, kind: input, shape index: {}]   ;;  %s1086_s0 = inlined_call_operand.vmem [shape: bf16[128,128], index: 0, kind: input, shape index: {}]   ;;  %s1087_s2 = inlined_call_operand.vmem [shape: bf16[128,256], index: 2, kind: input, shape index: {}]   ;;  %s1088_s3 = inlined_call_operand.vmem [shape: f32[1,256], index: 3, kind: input, shape index: {}]   ;;  %s1089_s4 = inlined_call_operand.vmem [shape: bf16[128,256], index: 4, kind: output, shape index: {}]  }
   0x1   :  { %v836_v0 = vld [vmem:[%s1085_s1 + $0x38] sm:$0xff]   ;;  %v837_v1 = vld [vmem:[%s1085_s1 + $0x30] sm:$0xff]   ;;  %v838_v2 = vld [vmem:[%s1085_s1 + $0x28] sm:$0xff]   ;;  %498 = vmatprep.mubr.bf16.mxu1 %v876_v32 }
   0x2   :  { %787 = vmatprep.subr.bf16.mxu0 %v836_v0  ;;  %v839_v3 = vld [vmem:[%s1085_s1 + $0x20] sm:$0xff]   ;;  %v840_v5 = vld [vmem:[%s1085_s1 + $0x18] sm:$0xff]   ;;  %v841_v6 = vld [vmem:[%s1085_s1 + $0x10] sm:$0xff]   ;;  %v357_v58 = vshrl.u32 %v356_v57, 7 }
   0x3   :  { %788 = vmatpush3.bf16.msra.mxu0 %v836_v0  ;;  %v844_v4 = vld [vmem:[%s1086_s0] sm:$0xff]   ;;  %v854_v7 = vld [vmem:[%s1087_s2 + $0x74] ss:$8 sps:$4 sm:$0xff]   ;;  %v852_v8 = vld [vmem:[%s1087_s2 + $0x70] ss:$8 sps:$4 sm:$0xff]  }
   0x4   :  { %789 = vmatprep.subr.bf16.mxu0 %v837_v1  ;;  %803 = vmatprep.mubr.bf16.mxu0 %v844_v4  ;;  %v857_v9 = vld [vmem:[%s1087_s2 + $0x64] ss:$8 sps:$4 sm:$0xff]   ;;  %v855_v11 = vld [vmem:[%s1087_s2 + $0x60] ss:$8 sps:$4 sm:$0xff]   ;;  %v860_v13 = vld [vmem:[%s1087_s2 + $0x54] ss:$8 sps:$4 sm:$0xff]  }
   0x5   :  { %819 = vmatprep.subr.bf16.mxu1 %v854_v7  ;;  %v842_v10 = vld [vmem:[%s1085_s1 + $0x8] sm:$0xff]   ;;  %v843_v12 = vld [vmem:[%s1085_s1] sm:$0xff]   ;;  %v858_v14 = vld [vmem:[%s1087_s2 + $0x50] ss:$8 sps:$4 sm:$0xff]   ;;  %v358_v59 = vsub.s32 0, %v357_v58  ;;  %v362_v61 = vsub.s32 1, %v357_v58 }
   0x6   :  { %827 = vmatpush1.bf16.msra.mxu1 %v852_v8  ;;  %v863_v15 = vld [vmem:[%s1087_s2 + $0x44] ss:$8 sps:$4 sm:$0xff]   ;;  %v861_v17 = vld [vmem:[%s1087_s2 + $0x40] ss:$8 sps:$4 sm:$0xff]   ;;  %v846_v18 = vld [vmem:[%s1086_s0 + $0x10] sm:$0xff]  }
   0x7   :  { %790 = vmatpush3.bf16.msra.mxu0 %v837_v1  ;;  %820 = vmatprep.subr.bf16.mxu1 %v857_v9  ;;  %v845_v16 = vld [vmem:[%s1086_s0 + $0x8] sm:$0xff]   ;;  %v866_v19 = vld [vmem:[%s1087_s2 + $0x34] ss:$8 sps:$4 sm:$0xff]   ;;  %v864_v20 = vld [vmem:[%s1087_s2 + $0x30] ss:$8 sps:$4 sm:$0xff]  }
   0x8   :  { %791 = vmatprep.subr.bf16.mxu0 %v838_v2  ;;  %v869_v21 = vld [vmem:[%s1087_s2 + $0x24] ss:$8 sps:$4 sm:$0xff]   ;;  %v847_v22 = vld [vmem:[%s1086_s0 + $0x18] sm:$0xff]   ;;  %v867_v23 = vld [vmem:[%s1087_s2 + $0x20] ss:$8 sps:$4 sm:$0xff]  }
   0x9   :  { %v848_v24 = vld [vmem:[%s1086_s0 + $0x20] sm:$0xff]   ;;  %v849_v25 = vld [vmem:[%s1086_s0 + $0x28] sm:$0xff]   ;;  %v850_v26 = vld [vmem:[%s1086_s0 + $0x30] sm:$0xff]  }
   0xa   :  { %828 = vmatpush1.bf16.msra.mxu1 %v855_v11  ;;  %v851_v27 = vld [vmem:[%s1086_s0 + $0x38] sm:$0xff]   ;;  %v875_v30 = vld [vmem:[%s1087_s2 + $0x4] ss:$8 sps:$4 sm:$0xff]   ;;  %v873_v31 = vld [vmem:[%s1087_s2] ss:$8 sps:$4 sm:$0xff]  }
   0xb   :  { %792 = vmatpush3.bf16.msra.mxu0 %v838_v2  ;;  %821 = vmatprep.subr.bf16.mxu1 %v860_v13  ;;  %v872_v28 = vld [vmem:[%s1087_s2 + $0x14] ss:$8 sps:$4 sm:$0xff]   ;;  %v870_v29 = vld [vmem:[%s1087_s2 + $0x10] ss:$8 sps:$4 sm:$0xff]   ;;  %v354_v60 = vld [vmem:[%s1088_s3] sm:$0x3] }
   0xc   :  { %793 = vmatprep.subr.bf16.mxu0 %v839_v3  ;;  %v1001_v62 = vrot.slane %v354_v60, %v358_v59  ;;  %v1003_v63 = vrot.slane %v354_v60, %v362_v61 }
   0xe   :  { %829 = vmatpush1.bf16.msra.mxu1 %v858_v14 }
   0xf   :  { %794 = vmatpush3.bf16.msra.mxu0 %v839_v3  ;;  %822 = vmatprep.subr.bf16.mxu1 %v863_v15 }
  0x10   :  { %795 = vmatprep.subr.bf16.mxu0 %v840_v5 }
  0x12   :  { %830 = vmatpush1.bf16.msra.mxu1 %v861_v17 }
  0x13   :  { %796 = vmatpush3.bf16.msra.mxu0 %v840_v5  ;;  %823 = vmatprep.subr.bf16.mxu1 %v866_v19 }
  0x14   :  { %797 = vmatprep.subr.bf16.mxu0 %v841_v6 }
  0x16   :  { %831 = vmatpush1.bf16.msra.mxu1 %v864_v20 }
  0x17   :  { %798 = vmatpush3.bf16.msra.mxu0 %v841_v6  ;;  %824 = vmatprep.subr.bf16.mxu1 %v869_v21 }
  0x18   :  { %799 = vmatprep.subr.bf16.mxu0 %v842_v10 }
  0x1a   :  { %832 = vmatpush1.bf16.msra.mxu1 %v867_v23 }
  0x1b   :  { %800 = vmatpush3.bf16.msra.mxu0 %v842_v10  ;;  %825 = vmatprep.subr.bf16.mxu1 %v872_v28 }
  0x1c   :  { %801 = vmatprep.subr.bf16.mxu0 %v843_v12 }
  0x1e   :  { %833 = vmatpush1.bf16.msra.mxu1 %v870_v29 }
  0x1f   :  { %802 = vmatpush3.bf16.msra.mxu0 %v843_v12  ;;  %826 = vmatprep.subr.bf16.mxu1 %v875_v30 }
  0x20   :  { %446 = vmatprep.subr.bf16.mxu0 %v854_v7 }
  0x22   :  { %804 = vmatmul.mubr.bf16.vlgmr.msra.gmra.mxu0 %v845_v16  ;;  %834 = vmatpush1.bf16.msra.mxu1 %v873_v31 }
  0x23   :  { %807 = vmatprep.mubr.bf16.mxu0 %v846_v18  ;;  %447 = vmatpush1.bf16.msra.mxu0 %v852_v8 }
  0x24   :  { %448 = vmatprep.subr.bf16.mxu0 %v857_v9 }
  0x27   :  { %449 = vmatpush1.bf16.msra.mxu0 %v855_v11 }
  0x28   :  { %450 = vmatprep.subr.bf16.mxu0 %v860_v13 }
  0x2a   :  { %808 = vmatmul.mubr.bf16.gmra.mxu0 %v847_v22 }
  0x2b   :  { %811 = vmatprep.mubr.bf16.mxu0 %v848_v24  ;;  %451 = vmatpush1.bf16.msra.mxu0 %v858_v14 }
  0x2c   :  { %452 = vmatprep.subr.bf16.mxu0 %v863_v15 }
  0x2f   :  { %453 = vmatpush1.bf16.msra.mxu0 %v861_v17 }
  0x30   :  { %454 = vmatprep.subr.bf16.mxu0 %v866_v19 }
  0x32   :  { %812 = vmatmul.mubr.bf16.gmra.mxu0 %v849_v25 }
  0x33   :  { %815 = vmatprep.mubr.bf16.mxu0 %v850_v26  ;;  %455 = vmatpush1.bf16.msra.mxu0 %v864_v20 }
  0x34   :  { %456 = vmatprep.subr.bf16.mxu0 %v869_v21 }
  0x37   :  { %457 = vmatpush1.bf16.msra.mxu0 %v867_v23 }
  0x38   :  { %458 = vmatprep.subr.bf16.mxu0 %v872_v28 }
  0x3a   :  { %816 = vmatmul.mubr.bf16.gmra.mxu0 %v851_v27 }
  0x3b   :  { %459 = vmatpush1.bf16.msra.mxu0 %v870_v29  ;;  %478 = vmatprep.mubr.bf16.mxu0 %v876_v32 }
  0x3c   :  { %460 = vmatprep.subr.bf16.mxu0 %v875_v30 }
  0x3f   :  { %461 = vmatpush1.bf16.msra.mxu0 %v873_v31 }
  0xe2   :  { %v805_v33 = vpop.f32.mrf.mxu0 }
  0xe4   :  { %v216_v34 = vpop.f32.mrf.mxu0 }
  0xe6   :  { %v806_v35 = vpop.f32.mrf.mxu0 }
  0xe7   :  { %v331_v42 = vpack.c.bf16 %v806_v35, %v805_v33 }
  0xe8   :  { %v219_v36 = vpop.f32.mrf.mxu0 }
  0xe9   :  { %v330_v37 = vpack.c.bf16 %v219_v36, %v216_v34 }
  0xea   :  { %v809_v38 = vpop.f32.mrf.mxu0 }
  0xeb   :  { %479 = vmatmul.mubr.bf16.vlgmr.msra.gmra.mxu0 %v330_v37 }
  0xec   :  { %v232_v39 = vpop.f32.mrf.mxu0  ;;  %488 = vmatprep.mubr.bf16.mxu0 %v876_v32 }
  0xee   :  { %v810_v40 = vpop.f32.mrf.mxu0 }
  0xef   :  { %v333_v46 = vpack.c.bf16 %v810_v40, %v809_v38 }
  0xf0   :  { %v235_v41 = vpop.f32.mrf.mxu0 }
  0xf1   :  { %v332_v43 = vpack.c.bf16 %v235_v41, %v232_v39 }
  0xf2   :  { %v813_v44 = vpop.f32.mrf.mxu0 }
  0xf3   :  { %489 = vmatmul.mubr.bf16.gmra.mxu0 %v331_v42  ;;  %499 = vmatmul.mubr.bf16.vlgmr.msra.gmra.mxu1 %v332_v43 }
  0xf4   :  { %508 = vmatprep.mubr.bf16.mxu1 %v876_v32  ;;  %v248_v45 = vpop.f32.mrf.mxu0 }
  0xf6   :  { %v814_v47 = vpop.f32.mrf.mxu0 }
  0xf7   :  { %v335_v52 = vpack.c.bf16 %v814_v47, %v813_v44 }
  0xf8   :  { %v251_v48 = vpop.f32.mrf.mxu0 }
  0xf9   :  { %v334_v49 = vpack.c.bf16 %v251_v48, %v248_v45 }
  0xfa   :  { %v817_v50 = vpop.f32.mrf.mxu0 }
  0xfb   :  { %509 = vmatmul.mubr.bf16.gmra.mxu1 %v333_v46 }
  0xfc   :  { %518 = vmatprep.mubr.bf16.mxu1 %v876_v32  ;;  %v264_v51 = vpop.f32.mrf.mxu0 }
  0xfe   :  { %v818_v53 = vpop.f32.mrf.mxu0 }
  0xff   :  { %v337_v56 = vpack.c.bf16 %v818_v53, %v817_v50 }
 0x100   :  { %v267_v54 = vpop.f32.mrf.mxu0 }
 0x101   :  { %v336_v55 = vpack.c.bf16 %v267_v54, %v264_v51 }
 0x103   :  { %519 = vmatmul.mubr.bf16.gmra.mxu1 %v334_v49 }
 0x104   :  { %528 = vmatprep.mubr.bf16.mxu1 %v876_v32 }
 0x10b   :  { %529 = vmatmul.mubr.bf16.gmra.mxu1 %v335_v52 }
 0x10c   :  { %538 = vmatprep.mubr.bf16.mxu1 %v876_v32 }
 0x113   :  { %539 = vmatmul.mubr.bf16.gmra.mxu1 %v336_v55 }
 0x114   :  { %548 = vmatprep.mubr.bf16.mxu1 %v876_v32 }
 0x11b   :  { %549 = vmatmul.mubr.bf16.gmra.mxu1 %v337_v56 }
 0x1ab   :  { %v480_v0 = vpop.f32.mrf.mxu0 }
 0x1ac   :  { %v481_v1 = vadd.f32 %v480_v0, %v1001_v62 }
 0x1ad   :  { %v482_v2 = vpop.f32.mrf.mxu0 }
 0x1ae   :  { %v483_v3 = vadd.f32 %v482_v2, %v1003_v63  ;;  %v559_v5 = vmax.f32 %v481_v1, 0.0 }
 0x1af   :  { %v484_v4 = vpop.f32.mrf.mxu0 }
 0x1b0   :  { %v560_v6 = vmax.f32 %v483_v3, 0.0  ;;  %v485_v7 = vadd.f32 %v484_v4, %v1001_v62 }
 0x1b1   :  { %v486_v8 = vpop.f32.mrf.mxu0 }
 0x1b2   :  { %v755_v9 = vpack.c.bf16 %v560_v6, %v559_v5  ;;  %v487_v10 = vadd.f32 %v486_v8, %v1003_v63  ;;  %v561_v13 = vmax.f32 %v485_v7, 0.0 }
 0x1b3   :  { %v490_v11 = vpop.f32.mrf.mxu0  ;;  %v500_v12 = vpop.f32.mrf.mxu1 }
 0x1b4   :  { %687 = vst [vmem:[%s1089_s4] sm:$0xff] %v755_v9  ;;  %v562_v14 = vmax.f32 %v487_v10, 0.0  ;;  %v491_v15 = vadd.f32 %v490_v11, %v1001_v62  ;;  %v501_v16 = vadd.f32 %v500_v12, %v1001_v62 }
 0x1b5   :  { %v492_v17 = vpop.f32.mrf.mxu0  ;;  %v502_v18 = vpop.f32.mrf.mxu1 }
 0x1b6   :  { %v756_v19 = vpack.c.bf16 %v562_v14, %v561_v13  ;;  %v493_v20 = vadd.f32 %v492_v17, %v1003_v63  ;;  %v503_v21 = vadd.f32 %v502_v18, %v1003_v63  ;;  %v563_v24 = vmax.f32 %v491_v15, 0.0 }
 0x1b7   :  { %v494_v22 = vpop.f32.mrf.mxu0  ;;  %v504_v23 = vpop.f32.mrf.mxu1  ;;  %v567_v27 = vmax.f32 %v501_v16, 0.0 }
 0x1b8   :  { %688 = vst [vmem:[%s1089_s4 + $0x8] sm:$0xff] %v756_v19  ;;  %v564_v25 = vmax.f32 %v493_v20, 0.0  ;;  %v495_v26 = vadd.f32 %v494_v22, %v1001_v62  ;;  %v568_v28 = vmax.f32 %v503_v21, 0.0  ;;  %v505_v29 = vadd.f32 %v504_v23, %v1001_v62 }
 0x1b9   :  { %v496_v30 = vpop.f32.mrf.mxu0  ;;  %v506_v31 = vpop.f32.mrf.mxu1 }
 0x1ba   :  { %v757_v32 = vpack.c.bf16 %v564_v25, %v563_v24  ;;  %v497_v33 = vadd.f32 %v496_v30, %v1003_v63  ;;  %v759_v34 = vpack.c.bf16 %v568_v28, %v567_v27  ;;  %v507_v35 = vadd.f32 %v506_v31, %v1003_v63 }
 0x1bb   :  { %v510_v36 = vpop.f32.mrf.mxu1  ;;  %v565_v37 = vmax.f32 %v495_v26, 0.0  ;;  %v569_v40 = vmax.f32 %v505_v29, 0.0 }
 0x1bc   :  { %689 = vst [vmem:[%s1089_s4 + $0x10] sm:$0xff] %v757_v32  ;;  %v566_v38 = vmax.f32 %v497_v33, 0.0  ;;  %v511_v39 = vadd.f32 %v510_v36, %v1001_v62  ;;  %691 = vst [vmem:[%s1089_s4 + $0x20] sm:$0xff] %v759_v34  ;;  %v570_v41 = vmax.f32 %v507_v35, 0.0 }
 0x1bd   :  { %v512_v42 = vpop.f32.mrf.mxu1 }
 0x1be   :  { %v758_v43 = vpack.c.bf16 %v566_v38, %v565_v37  ;;  %v513_v44 = vadd.f32 %v512_v42, %v1003_v63  ;;  %v760_v45 = vpack.c.bf16 %v570_v41, %v569_v40  ;;  %v571_v47 = vmax.f32 %v511_v39, 0.0 }
 0x1bf   :  { %v514_v46 = vpop.f32.mrf.mxu1 }
 0x1c0   :  { %690 = vst [vmem:[%s1089_s4 + $0x18] sm:$0xff] %v758_v43  ;;  %v572_v48 = vmax.f32 %v513_v44, 0.0  ;;  %v515_v49 = vadd.f32 %v514_v46, %v1001_v62  ;;  %692 = vst [vmem:[%s1089_s4 + $0x28] sm:$0xff] %v760_v45 }
 0x1c1   :  { %v516_v50 = vpop.f32.mrf.mxu1 }
 0x1c2   :  { %v761_v51 = vpack.c.bf16 %v572_v48, %v571_v47  ;;  %v517_v52 = vadd.f32 %v516_v50, %v1003_v63  ;;  %v573_v54 = vmax.f32 %v515_v49, 0.0 }
 0x1c3   :  { %v520_v53 = vpop.f32.mrf.mxu1 }
 0x1c4   :  { %693 = vst [vmem:[%s1089_s4 + $0x30] sm:$0xff] %v761_v51  ;;  %v574_v55 = vmax.f32 %v517_v52, 0.0  ;;  %v521_v56 = vadd.f32 %v520_v53, %v1001_v62 }
 0x1c5   :  { %v522_v57 = vpop.f32.mrf.mxu1 }
 0x1c6   :  { %v762_v58 = vpack.c.bf16 %v574_v55, %v573_v54  ;;  %v523_v59 = vadd.f32 %v522_v57, %v1003_v63  ;;  %v575_v61 = vmax.f32 %v521_v56, 0.0 }
 0x1c7   :  { %v524_v60 = vpop.f32.mrf.mxu1 }
 0x1c8   :  { %694 = vst [vmem:[%s1089_s4 + $0x38] sm:$0xff] %v762_v58  ;;  %v576_v0 = vmax.f32 %v523_v59, 0.0  ;;  %v525_v1 = vadd.f32 %v524_v60, %v1001_v62 }
 0x1c9   :  { %v526_v2 = vpop.f32.mrf.mxu1 }
 0x1ca   :  { %v763_v3 = vpack.c.bf16 %v576_v0, %v575_v61  ;;  %v527_v4 = vadd.f32 %v526_v2, %v1003_v63  ;;  %v577_v6 = vmax.f32 %v525_v1, 0.0 }
 0x1cb   :  { %v530_v5 = vpop.f32.mrf.mxu1 }
 0x1cc   :  { %695 = vst [vmem:[%s1089_s4 + $0x40] sm:$0xff] %v763_v3  ;;  %v578_v7 = vmax.f32 %v527_v4, 0.0  ;;  %v531_v8 = vadd.f32 %v530_v5, %v1001_v62 }
 0x1cd   :  { %v532_v9 = vpop.f32.mrf.mxu1 }
 0x1ce   :  { %v764_v10 = vpack.c.bf16 %v578_v7, %v577_v6  ;;  %v533_v11 = vadd.f32 %v532_v9, %v1003_v63  ;;  %v579_v13 = vmax.f32 %v531_v8, 0.0 }
 0x1cf   :  { %v534_v12 = vpop.f32.mrf.mxu1 }
 0x1d0   :  { %696 = vst [vmem:[%s1089_s4 + $0x48] sm:$0xff] %v764_v10  ;;  %v580_v14 = vmax.f32 %v533_v11, 0.0  ;;  %v535_v15 = vadd.f32 %v534_v12, %v1001_v62 }
 0x1d1   :  { %v536_v16 = vpop.f32.mrf.mxu1 }
 0x1d2   :  { %v765_v17 = vpack.c.bf16 %v580_v14, %v579_v13  ;;  %v537_v18 = vadd.f32 %v536_v16, %v1003_v63  ;;  %v581_v20 = vmax.f32 %v535_v15, 0.0 }
 0x1d3   :  { %v540_v19 = vpop.f32.mrf.mxu1 }
 0x1d4   :  { %697 = vst [vmem:[%s1089_s4 + $0x50] sm:$0xff] %v765_v17  ;;  %v582_v21 = vmax.f32 %v537_v18, 0.0  ;;  %v541_v22 = vadd.f32 %v540_v19, %v1001_v62 }
 0x1d5   :  { %v542_v23 = vpop.f32.mrf.mxu1 }
 0x1d6   :  { %v766_v24 = vpack.c.bf16 %v582_v21, %v581_v20  ;;  %v543_v25 = vadd.f32 %v542_v23, %v1003_v63  ;;  %v583_v27 = vmax.f32 %v541_v22, 0.0 }
 0x1d7   :  { %v544_v26 = vpop.f32.mrf.mxu1 }
 0x1d8   :  { %698 = vst [vmem:[%s1089_s4 + $0x58] sm:$0xff] %v766_v24  ;;  %v584_v28 = vmax.f32 %v543_v25, 0.0  ;;  %v545_v29 = vadd.f32 %v544_v26, %v1001_v62 }
 0x1d9   :  { %v546_v30 = vpop.f32.mrf.mxu1 }
 0x1da   :  { %v767_v31 = vpack.c.bf16 %v584_v28, %v583_v27  ;;  %v547_v32 = vadd.f32 %v546_v30, %v1003_v63  ;;  %v585_v34 = vmax.f32 %v545_v29, 0.0 }
 0x1db   :  { %v550_v33 = vpop.f32.mrf.mxu1 }
 0x1dc   :  { %699 = vst [vmem:[%s1089_s4 + $0x60] sm:$0xff] %v767_v31  ;;  %v586_v35 = vmax.f32 %v547_v32, 0.0  ;;  %v551_v36 = vadd.f32 %v550_v33, %v1001_v62 }
 0x1dd   :  { %v552_v37 = vpop.f32.mrf.mxu1 }
 0x1de   :  { %v768_v38 = vpack.c.bf16 %v586_v35, %v585_v34  ;;  %v553_v39 = vadd.f32 %v552_v37, %v1003_v63  ;;  %v587_v41 = vmax.f32 %v551_v36, 0.0 }
 0x1df   :  { %v554_v40 = vpop.f32.mrf.mxu1 }
 0x1e0   :  { %700 = vst [vmem:[%s1089_s4 + $0x68] sm:$0xff] %v768_v38  ;;  %v588_v42 = vmax.f32 %v553_v39, 0.0  ;;  %v555_v43 = vadd.f32 %v554_v40, %v1001_v62 }
 0x1e1   :  { %v556_v44 = vpop.f32.mrf.mxu1 }
 0x1e2   :  { %v769_v45 = vpack.c.bf16 %v588_v42, %v587_v41  ;;  %v557_v46 = vadd.f32 %v556_v44, %v1003_v63  ;;  %v589_v47 = vmax.f32 %v555_v43, 0.0 }
 0x1e4   :  { %701 = vst [vmem:[%s1089_s4 + $0x70] sm:$0xff] %v769_v45  ;;  %v590_v48 = vmax.f32 %v557_v46, 0.0 }
 0x1e6   :  { %v770_v49 = vpack.c.bf16 %v590_v48, %v589_v47 }
 0x1e8   :  { %702 = vst [vmem:[%s1089_s4 + $0x78] sm:$0xff] %v770_v49 }

// kernel: encoder_forward.5
= control target key start
LH: loop header
LB: loop body
LE: loop exit
PB: predicated region body
PF: predicated region fallthrough
CT: control target
= control target key end

     0   :  { %v996_v1 = vmov 0   ;;  %s1333_s1 = inlined_call_operand.vmem [shape: bf16[128,256], index: 1, kind: input, shape index: {}]   ;;  %s1334_s0 = inlined_call_operand.vmem [shape: bf16[128,128], index: 0, kind: input, shape index: {}]   ;;  %s1335_s2 = inlined_call_operand.vmem [shape: bf16[256,256], index: 2, kind: input, shape index: {}]   ;;  %s1336_s3 = inlined_call_operand.vmem [shape: f32[1,256], index: 3, kind: input, shape index: {}]   ;;  %s1337_s4 = inlined_call_operand.vmem [shape: f32[128,256], index: 4, kind: output, shape index: {}]  }
   0x1   :  { %v916_v0 = vld [vmem:[%s1333_s1 + $0x74] ss:$8 sps:$4 sm:$0xff]   ;;  %278 = vmatprep.mubr.bf16.mxu0 %v996_v1  ;;  %v918_v2 = vld [vmem:[%s1333_s1 + $0x70] ss:$8 sps:$4 sm:$0xff]   ;;  %v919_v3 = vld [vmem:[%s1333_s1 + $0x64] ss:$8 sps:$4 sm:$0xff]  }
   0x2   :  { %246 = vmatprep.subr.bf16.mxu0 %v916_v0  ;;  %v921_v4 = vld [vmem:[%s1333_s1 + $0x60] ss:$8 sps:$4 sm:$0xff]   ;;  %v922_v5 = vld [vmem:[%s1333_s1 + $0x54] ss:$8 sps:$4 sm:$0xff]   ;;  %v924_v6 = vld [vmem:[%s1333_s1 + $0x50] ss:$8 sps:$4 sm:$0xff]  }
   0x3   :  { %247 = vmatpush1.bf16.msra.mxu0 %v918_v2  ;;  %v925_v7 = vld [vmem:[%s1333_s1 + $0x44] ss:$8 sps:$4 sm:$0xff]   ;;  %v927_v8 = vld [vmem:[%s1333_s1 + $0x40] ss:$8 sps:$4 sm:$0xff]   ;;  %v928_v9 = vld [vmem:[%s1333_s1 + $0x34] ss:$8 sps:$4 sm:$0xff]  }
   0x4   :  { %248 = vmatprep.subr.bf16.mxu0 %v919_v3  ;;  %v930_v10 = vld [vmem:[%s1333_s1 + $0x30] ss:$8 sps:$4 sm:$0xff]   ;;  %v931_v11 = vld [vmem:[%s1333_s1 + $0x24] ss:$8 sps:$4 sm:$0xff]   ;;  %v933_v12 = vld [vmem:[%s1333_s1 + $0x20] ss:$8 sps:$4 sm:$0xff]  }
   0x5   :  { %v934_v13 = vld [vmem:[%s1333_s1 + $0x14] ss:$8 sps:$4 sm:$0xff]   ;;  %v948_v15 = vld [vmem:[%s1335_s2 + $0x70] ss:$8 sps:$4 sm:$0xff]   ;;  %v953_v16 = vld [vmem:[%s1335_s2 + $0x64] ss:$8 sps:$4 sm:$0xff]  }
   0x6   :  { %v950_v14 = vld [vmem:[%s1335_s2 + $0x74] ss:$8 sps:$4 sm:$0xff]   ;;  %v936_v17 = vld [vmem:[%s1333_s1 + $0x10] ss:$8 sps:$4 sm:$0xff]   ;;  %v937_v18 = vld [vmem:[%s1333_s1 + $0x4] ss:$8 sps:$4 sm:$0xff]  }
   0x7   :  { %249 = vmatpush1.bf16.msra.mxu0 %v921_v4  ;;  %883 = vmatprep.subr.bf16.mxu1 %v950_v14  ;;  %v951_v19 = vld [vmem:[%s1335_s2 + $0x60] ss:$8 sps:$4 sm:$0xff]   ;;  %v956_v20 = vld [vmem:[%s1335_s2 + $0x54] ss:$8 sps:$4 sm:$0xff]   ;;  %v954_v22 = vld [vmem:[%s1335_s2 + $0x50] ss:$8 sps:$4 sm:$0xff]  }
   0x8   :  { %250 = vmatprep.subr.bf16.mxu0 %v922_v5  ;;  %899 = vmatpush1.bf16.msra.mxu1 %v948_v15  ;;  %v939_v21 = vld [vmem:[%s1333_s1] ss:$8 sps:$4 sm:$0xff]   ;;  %v959_v23 = vld [vmem:[%s1335_s2 + $0x44] ss:$8 sps:$4 sm:$0xff]   ;;  %v962_v26 = vld [vmem:[%s1335_s2 + $0x34] ss:$8 sps:$4 sm:$0xff]  }
   0x9   :  { %884 = vmatprep.subr.bf16.mxu1 %v953_v16  ;;  %v940_v24 = vld [vmem:[%s1334_s0] sm:$0xff]   ;;  %v960_v27 = vld [vmem:[%s1335_s2 + $0x30] ss:$8 sps:$4 sm:$0xff]   ;;  %v941_v29 = vld [vmem:[%s1334_s0 + $0x8] sm:$0xff]  }
   0xa   :  { %v957_v25 = vld [vmem:[%s1335_s2 + $0x40] ss:$8 sps:$4 sm:$0xff]   ;;  %v965_v28 = vld [vmem:[%s1335_s2 + $0x24] ss:$8 sps:$4 sm:$0xff]   ;;  %v968_v31 = vld [vmem:[%s1335_s2 + $0x14] ss:$8 sps:$4 sm:$0xff]  }
   0xb   :  { %251 = vmatpush1.bf16.msra.mxu0 %v924_v6  ;;  %v963_v30 = vld [vmem:[%s1335_s2 + $0x20] ss:$8 sps:$4 sm:$0xff]   ;;  %v966_v32 = vld [vmem:[%s1335_s2 + $0x10] ss:$8 sps:$4 sm:$0xff]   ;;  %v971_v33 = vld [vmem:[%s1335_s2 + $0x4] ss:$8 sps:$4 sm:$0xff]  }
   0xc   :  { %252 = vmatprep.subr.bf16.mxu0 %v925_v7  ;;  %900 = vmatpush1.bf16.msra.mxu1 %v951_v19  ;;  %v942_v34 = vld [vmem:[%s1334_s0 + $0x10] sm:$0xff]   ;;  %v969_v35 = vld [vmem:[%s1335_s2] ss:$8 sps:$4 sm:$0xff]   ;;  %v977_v38 = vld [vmem:[%s1335_s2 + $0xe4] ss:$8 sps:$4 sm:$0xff]  }
   0xd   :  { %885 = vmatprep.subr.bf16.mxu1 %v956_v20  ;;  %v974_v36 = vld [vmem:[%s1335_s2 + $0xf4] ss:$8 sps:$4 sm:$0xff]   ;;  %v972_v37 = vld [vmem:[%s1335_s2 + $0xf0] ss:$8 sps:$4 sm:$0xff]   ;;  %v975_v40 = vld [vmem:[%s1335_s2 + $0xe0] ss:$8 sps:$4 sm:$0xff]  }
   0xe   :  { %v943_v39 = vld [vmem:[%s1334_s0 + $0x18] sm:$0xff]   ;;  %v983_v43 = vld [vmem:[%s1335_s2 + $0xc4] ss:$8 sps:$4 sm:$0xff]   ;;  %v981_v45 = vld [vmem:[%s1335_s2 + $0xc0] ss:$8 sps:$4 sm:$0xff]  }
   0xf   :  { %253 = vmatpush1.bf16.msra.mxu0 %v927_v8  ;;  %v980_v41 = vld [vmem:[%s1335_s2 + $0xd4] ss:$8 sps:$4 sm:$0xff]   ;;  %v978_v42 = vld [vmem:[%s1335_s2 + $0xd0] ss:$8 sps:$4 sm:$0xff]   ;;  %v944_v44 = vld [vmem:[%s1334_s0 + $0x20] sm:$0xff]  }
  0x10   :  { %254 = vmatprep.subr.bf16.mxu0 %v928_v9  ;;  %901 = vmatpush1.bf16.msra.mxu1 %v954_v22  ;;  %v986_v46 = vld [vmem:[%s1335_s2 + $0xb4] ss:$8 sps:$4 sm:$0xff]   ;;  %v984_v47 = vld [vmem:[%s1335_s2 + $0xb0] ss:$8 sps:$4 sm:$0xff]   ;;  %v989_v48 = vld [vmem:[%s1335_s2 + $0xa4] ss:$8 sps:$4 sm:$0xff]  }
  0x11   :  { %886 = vmatprep.subr.bf16.mxu1 %v959_v23  ;;  %v945_v49 = vld [vmem:[%s1334_s0 + $0x28] sm:$0xff]   ;;  %v946_v51 = vld [vmem:[%s1334_s0 + $0x30] sm:$0xff]   ;;  %v947_v52 = vld [vmem:[%s1334_s0 + $0x38] sm:$0xff]  }
  0x12   :  { %v987_v50 = vld [vmem:[%s1335_s2 + $0xa0] ss:$8 sps:$4 sm:$0xff]   ;;  %v992_v53 = vld [vmem:[%s1335_s2 + $0x94] ss:$8 sps:$4 sm:$0xff]   ;;  %v990_v54 = vld [vmem:[%s1335_s2 + $0x90] ss:$8 sps:$4 sm:$0xff]  }
  0x13   :  { %255 = vmatpush1.bf16.msra.mxu0 %v930_v10  ;;  %v995_v55 = vld [vmem:[%s1335_s2 + $0x84] ss:$8 sps:$4 sm:$0xff]   ;;  %v993_v56 = vld [vmem:[%s1335_s2 + $0x80] ss:$8 sps:$4 sm:$0xff]  }
  0x14   :  { %256 = vmatprep.subr.bf16.mxu0 %v931_v11  ;;  %902 = vmatpush1.bf16.msra.mxu1 %v957_v25 }
  0x15   :  { %887 = vmatprep.subr.bf16.mxu1 %v962_v26 }
  0x17   :  { %257 = vmatpush1.bf16.msra.mxu0 %v933_v12 }
  0x18   :  { %258 = vmatprep.subr.bf16.mxu0 %v934_v13  ;;  %903 = vmatpush1.bf16.msra.mxu1 %v960_v27 }
  0x19   :  { %888 = vmatprep.subr.bf16.mxu1 %v965_v28 }
  0x1b   :  { %259 = vmatpush1.bf16.msra.mxu0 %v936_v17 }
  0x1c   :  { %260 = vmatprep.subr.bf16.mxu0 %v937_v18  ;;  %904 = vmatpush1.bf16.msra.mxu1 %v963_v30 }
  0x1d   :  { %889 = vmatprep.subr.bf16.mxu1 %v968_v31 }
  0x1f   :  { %261 = vmatpush1.bf16.msra.mxu0 %v939_v21 }
  0x20   :  { %678 = vmatprep.subr.bf16.mxu0 %v950_v14  ;;  %905 = vmatpush1.bf16.msra.mxu1 %v966_v32 }
  0x21   :  { %890 = vmatprep.subr.bf16.mxu1 %v971_v33 }
  0x22   :  { %279 = vmatmul.mubr.bf16.vlgmr.msra.gmra.mxu0 %v940_v24 }
  0x23   :  { %288 = vmatprep.mubr.bf16.mxu0 %v996_v1  ;;  %679 = vmatpush1.bf16.msra.mxu0 %v948_v15 }
  0x24   :  { %680 = vmatprep.subr.bf16.mxu0 %v953_v16  ;;  %906 = vmatpush1.bf16.msra.mxu1 %v969_v35 }
  0x25   :  { %891 = vmatprep.subr.bf16.mxu1 %v974_v36 }
  0x27   :  { %681 = vmatpush1.bf16.msra.mxu0 %v951_v19 }
  0x28   :  { %682 = vmatprep.subr.bf16.mxu0 %v956_v20  ;;  %907 = vmatpush2.bf16.msra.mxu1 %v972_v37 }
  0x29   :  { %892 = vmatprep.subr.bf16.mxu1 %v977_v38 }
  0x2a   :  { %289 = vmatmul.mubr.bf16.gmra.mxu0 %v941_v29 }
  0x2b   :  { %298 = vmatprep.mubr.bf16.mxu0 %v996_v1  ;;  %683 = vmatpush1.bf16.msra.mxu0 %v954_v22 }
  0x2c   :  { %684 = vmatprep.subr.bf16.mxu0 %v959_v23  ;;  %908 = vmatpush2.bf16.msra.mxu1 %v975_v40 }
  0x2d   :  { %893 = vmatprep.subr.bf16.mxu1 %v980_v41 }
  0x2f   :  { %685 = vmatpush1.bf16.msra.mxu0 %v957_v25 }
  0x30   :  { %686 = vmatprep.subr.bf16.mxu0 %v962_v26  ;;  %909 = vmatpush2.bf16.msra.mxu1 %v978_v42 }
  0x31   :  { %894 = vmatprep.subr.bf16.mxu1 %v983_v43 }
  0x32   :  { %299 = vmatmul.mubr.bf16.gmra.mxu0 %v942_v34 }
  0x33   :  { %308 = vmatprep.mubr.bf16.mxu0 %v996_v1  ;;  %687 = vmatpush1.bf16.msra.mxu0 %v960_v27 }
  0x34   :  { %688 = vmatprep.subr.bf16.mxu0 %v965_v28  ;;  %910 = vmatpush2.bf16.msra.mxu1 %v981_v45 }
  0x35   :  { %895 = vmatprep.subr.bf16.mxu1 %v986_v46 }
  0x37   :  { %689 = vmatpush1.bf16.msra.mxu0 %v963_v30 }
  0x38   :  { %690 = vmatprep.subr.bf16.mxu0 %v968_v31  ;;  %911 = vmatpush2.bf16.msra.mxu1 %v984_v47 }
  0x39   :  { %896 = vmatprep.subr.bf16.mxu1 %v989_v48 }
  0x3a   :  { %309 = vmatmul.mubr.bf16.gmra.mxu0 %v943_v39 }
  0x3b   :  { %318 = vmatprep.mubr.bf16.mxu0 %v996_v1  ;;  %691 = vmatpush1.bf16.msra.mxu0 %v966_v32 }
  0x3c   :  { %692 = vmatprep.subr.bf16.mxu0 %v971_v33  ;;  %912 = vmatpush2.bf16.msra.mxu1 %v987_v50 }
  0x3d   :  { %897 = vmatprep.subr.bf16.mxu1 %v992_v53 }
  0x3f   :  { %693 = vmatpush1.bf16.msra.mxu0 %v969_v35 }
  0x40   :  { %694 = vmatprep.subr.bf16.mxu0 %v974_v36  ;;  %913 = vmatpush2.bf16.msra.mxu1 %v990_v54 }
  0x41   :  { %898 = vmatprep.subr.bf16.mxu1 %v995_v55 }
  0x42   :  { %319 = vmatmul.mubr.bf16.gmra.mxu0 %v944_v44  ;;  %v506_v44 = vld [vmem:[%s1336_s3] sm:$0x3] }
  0x43   :  { %328 = vmatprep.mubr.bf16.mxu0 %v996_v1  ;;  %695 = vmatpush2.bf16.msra.mxu0 %v972_v37 }
  0x44   :  { %696 = vmatprep.subr.bf16.mxu0 %v977_v38  ;;  %914 = vmatpush2.bf16.msra.mxu1 %v993_v56 }
  0x47   :  { %697 = vmatpush2.bf16.msra.mxu0 %v975_v40 }
  0x48   :  { %698 = vmatprep.subr.bf16.mxu0 %v980_v41  ;;  %v508_v41 = vlaneseq }
  0x4a   :  { %329 = vmatmul.mubr.bf16.gmra.mxu0 %v945_v49 }
  0x4b   :  { %338 = vmatprep.mubr.bf16.mxu0 %v996_v1  ;;  %699 = vmatpush2.bf16.msra.mxu0 %v978_v42  ;;  %v509_v42 = vshrl.u32 %v508_v41, 7 }
  0x4c   :  { %700 = vmatprep.subr.bf16.mxu0 %v983_v43 }
  0x4d   :  { %v510_v43 = vsub.s32 0, %v509_v42 }
  0x4f   :  { %701 = vmatpush2.bf16.msra.mxu0 %v981_v45  ;;  %v514_v45 = vsub.s32 1, %v509_v42 }
  0x50   :  { %702 = vmatprep.subr.bf16.mxu0 %v986_v46  ;;  %v1201_v46 = vrot.slane %v506_v44, %v510_v43 }
  0x52   :  { %339 = vmatmul.mubr.bf16.gmra.mxu0 %v946_v51 }
  0x53   :  { %348 = vmatprep.mubr.bf16.mxu0 %v996_v1  ;;  %703 = vmatpush2.bf16.msra.mxu0 %v984_v47  ;;  %v1203_v47 = vrot.slane %v506_v44, %v514_v45 }
  0x54   :  { %704 = vmatprep.subr.bf16.mxu0 %v989_v48 }
  0x57   :  { %705 = vmatpush2.bf16.msra.mxu0 %v987_v50 }
  0x58   :  { %706 = vmatprep.subr.bf16.mxu0 %v992_v53 }
  0x5a   :  { %349 = vmatmul.mubr.bf16.gmra.mxu0 %v947_v52 }
  0x5b   :  { %707 = vmatpush2.bf16.msra.mxu0 %v990_v54 }
  0x5c   :  { %708 = vmatprep.subr.bf16.mxu0 %v995_v55 }
  0x5f   :  { %709 = vmatpush2.bf16.msra.mxu0 %v993_v56 }
  0xe2   :  { %v280_v57 = vpop.f32.mrf.mxu0 }
  0xe4   :  { %v282_v58 = vpop.f32.mrf.mxu0 }
  0xe6   :  { %v284_v59 = vpop.f32.mrf.mxu0 }
  0xe7   :  { %v458_v62 = vpack.c.bf16 %v284_v59, %v280_v57 }
  0xe8   :  { %v286_v60 = vpop.f32.mrf.mxu0 }
  0xe9   :  { %v459_v61 = vpack.c.bf16 %v286_v60, %v282_v58 }
  0xea   :  { %v290_v63 = vpop.f32.mrf.mxu0 }
  0xeb   :  { %710 = vmatprep.mubr.bf16.mxu0 %v459_v61 }
  0xec   :  { %v292_v0 = vpop.f32.mrf.mxu0  ;;  %711 = vmatmul.mubr.bf16.vlgmr.msra.gmra.mxu0 %v458_v62 }
  0xee   :  { %v294_v1 = vpop.f32.mrf.mxu0 }
  0xef   :  { %v460_v4 = vpack.c.bf16 %v294_v1, %v290_v63 }
  0xf0   :  { %v296_v2 = vpop.f32.mrf.mxu0 }
  0xf1   :  { %v461_v3 = vpack.c.bf16 %v296_v2, %v292_v0 }
  0xf2   :  { %v300_v5 = vpop.f32.mrf.mxu0 }
  0xf3   :  { %720 = vmatprep.mubr.bf16.mxu0 %v461_v3 }
  0xf4   :  { %v302_v6 = vpop.f32.mrf.mxu0  ;;  %721 = vmatmul.mubr.bf16.gmra.mxu0 %v460_v4 }
  0xf6   :  { %v304_v7 = vpop.f32.mrf.mxu0 }
  0xf7   :  { %v462_v10 = vpack.c.bf16 %v304_v7, %v300_v5 }
  0xf8   :  { %v306_v8 = vpop.f32.mrf.mxu0 }
  0xf9   :  { %v463_v9 = vpack.c.bf16 %v306_v8, %v302_v6 }
  0xfa   :  { %v310_v11 = vpop.f32.mrf.mxu0 }
  0xfb   :  { %730 = vmatprep.mubr.bf16.mxu1 %v463_v9 }
  0xfc   :  { %v312_v12 = vpop.f32.mrf.mxu0  ;;  %731 = vmatmul.mubr.bf16.vlgmr.msra.gmra.mxu1 %v462_v10 }
  0xfe   :  { %v314_v13 = vpop.f32.mrf.mxu0 }
  0xff   :  { %v464_v16 = vpack.c.bf16 %v314_v13, %v310_v11 }
 0x100   :  { %v316_v14 = vpop.f32.mrf.mxu0 }
 0x101   :  { %v465_v15 = vpack.c.bf16 %v316_v14, %v312_v12 }
 0x102   :  { %v320_v17 = vpop.f32.mrf.mxu0 }
 0x103   :  { %740 = vmatprep.mubr.bf16.mxu1 %v465_v15 }
 0x104   :  { %v322_v18 = vpop.f32.mrf.mxu0  ;;  %741 = vmatmul.mubr.bf16.gmra.mxu1 %v464_v16 }
 0x106   :  { %v324_v19 = vpop.f32.mrf.mxu0 }
 0x107   :  { %v466_v22 = vpack.c.bf16 %v324_v19, %v320_v17 }
 0x108   :  { %v326_v20 = vpop.f32.mrf.mxu0 }
 0x109   :  { %v467_v21 = vpack.c.bf16 %v326_v20, %v322_v18 }
 0x10a   :  { %v330_v23 = vpop.f32.mrf.mxu0 }
 0x10b   :  { %750 = vmatprep.mubr.bf16.mxu1 %v467_v21 }
 0x10c   :  { %v332_v24 = vpop.f32.mrf.mxu0  ;;  %751 = vmatmul.mubr.bf16.gmra.mxu1 %v466_v22 }
 0x10e   :  { %v334_v25 = vpop.f32.mrf.mxu0 }
 0x10f   :  { %v468_v28 = vpack.c.bf16 %v334_v25, %v330_v23 }
 0x110   :  { %v336_v26 = vpop.f32.mrf.mxu0 }
 0x111   :  { %v469_v27 = vpack.c.bf16 %v336_v26, %v332_v24 }
 0x112   :  { %v340_v29 = vpop.f32.mrf.mxu0 }
 0x113   :  { %760 = vmatprep.mubr.bf16.mxu1 %v469_v27 }
 0x114   :  { %v342_v30 = vpop.f32.mrf.mxu0  ;;  %761 = vmatmul.mubr.bf16.gmra.mxu1 %v468_v28 }
 0x116   :  { %v344_v31 = vpop.f32.mrf.mxu0 }
 0x117   :  { %v470_v34 = vpack.c.bf16 %v344_v31, %v340_v29 }
 0x118   :  { %v346_v32 = vpop.f32.mrf.mxu0 }
 0x119   :  { %v471_v33 = vpack.c.bf16 %v346_v32, %v342_v30 }
 0x11a   :  { %v350_v35 = vpop.f32.mrf.mxu0 }
 0x11b   :  { %770 = vmatprep.mubr.bf16.mxu1 %v471_v33 }
 0x11c   :  { %v352_v36 = vpop.f32.mrf.mxu0  ;;  %771 = vmatmul.mubr.bf16.gmra.mxu1 %v470_v34 }
 0x11e   :  { %v354_v37 = vpop.f32.mrf.mxu0 }
 0x11f   :  { %v472_v40 = vpack.c.bf16 %v354_v37, %v350_v35 }
 0x120   :  { %v356_v38 = vpop.f32.mrf.mxu0 }
 0x121   :  { %v473_v39 = vpack.c.bf16 %v356_v38, %v352_v36 }
 0x123   :  { %780 = vmatprep.mubr.bf16.mxu1 %v473_v39 }
 0x124   :  { %781 = vmatmul.mubr.bf16.gmra.mxu1 %v472_v40 }
 0x1ac   :  { %v712_v48 = vpop.f32.mrf.mxu0 }
 0x1ad   :  { %v713_v49 = vadd.f32 %v712_v48, %v1201_v46 }
 0x1ae   :  { %v714_v50 = vpop.f32.mrf.mxu0 }
 0x1af   :  { %791 = vst [vmem:[%s1337_s4] sm:$0xff] %v713_v49  ;;  %v715_v51 = vadd.f32 %v714_v50, %v1203_v47 }
 0x1b0   :  { %v716_v52 = vpop.f32.mrf.mxu0 }
 0x1b1   :  { %792 = vst [vmem:[%s1337_s4 + $0x8] sm:$0xff] %v715_v51  ;;  %v717_v53 = vadd.f32 %v716_v52, %v1201_v46 }
 0x1b2   :  { %v718_v54 = vpop.f32.mrf.mxu0 }
 0x1b3   :  { %793 = vst [vmem:[%s1337_s4 + $0x10] sm:$0xff] %v717_v53  ;;  %v719_v55 = vadd.f32 %v718_v54, %v1203_v47 }
 0x1b4   :  { %v722_v56 = vpop.f32.mrf.mxu0 }
 0x1b5   :  { %794 = vst [vmem:[%s1337_s4 + $0x18] sm:$0xff] %v719_v55  ;;  %v723_v57 = vadd.f32 %v722_v56, %v1201_v46 }
 0x1b6   :  { %v724_v58 = vpop.f32.mrf.mxu0 }
 0x1b7   :  { %795 = vst [vmem:[%s1337_s4 + $0x20] sm:$0xff] %v723_v57  ;;  %v725_v59 = vadd.f32 %v724_v58, %v1203_v47 }
 0x1b8   :  { %v726_v60 = vpop.f32.mrf.mxu0 }
 0x1b9   :  { %796 = vst [vmem:[%s1337_s4 + $0x28] sm:$0xff] %v725_v59  ;;  %v727_v61 = vadd.f32 %v726_v60, %v1201_v46 }
 0x1ba   :  { %v728_v62 = vpop.f32.mrf.mxu0 }
 0x1bb   :  { %797 = vst [vmem:[%s1337_s4 + $0x30] sm:$0xff] %v727_v61  ;;  %v729_v63 = vadd.f32 %v728_v62, %v1203_v47 }
 0x1bc   :  { %v732_v0 = vpop.f32.mrf.mxu1 }
 0x1bd   :  { %798 = vst [vmem:[%s1337_s4 + $0x38] sm:$0xff] %v729_v63  ;;  %v733_v1 = vadd.f32 %v732_v0, %v1201_v46 }
 0x1be   :  { %v734_v2 = vpop.f32.mrf.mxu1 }
 0x1bf   :  { %799 = vst [vmem:[%s1337_s4 + $0x40] sm:$0xff] %v733_v1  ;;  %v735_v3 = vadd.f32 %v734_v2, %v1203_v47 }
 0x1c0   :  { %v736_v4 = vpop.f32.mrf.mxu1 }
 0x1c1   :  { %800 = vst [vmem:[%s1337_s4 + $0x48] sm:$0xff] %v735_v3  ;;  %v737_v5 = vadd.f32 %v736_v4, %v1201_v46 }
 0x1c2   :  { %v738_v6 = vpop.f32.mrf.mxu1 }
 0x1c3   :  { %801 = vst [vmem:[%s1337_s4 + $0x50] sm:$0xff] %v737_v5  ;;  %v739_v7 = vadd.f32 %v738_v6, %v1203_v47 }
 0x1c4   :  { %v742_v8 = vpop.f32.mrf.mxu1 }
 0x1c5   :  { %802 = vst [vmem:[%s1337_s4 + $0x58] sm:$0xff] %v739_v7  ;;  %v743_v9 = vadd.f32 %v742_v8, %v1201_v46 }
 0x1c6   :  { %v744_v10 = vpop.f32.mrf.mxu1 }
 0x1c7   :  { %803 = vst [vmem:[%s1337_s4 + $0x60] sm:$0xff] %v743_v9  ;;  %v745_v11 = vadd.f32 %v744_v10, %v1203_v47 }
 0x1c8   :  { %v746_v12 = vpop.f32.mrf.mxu1 }
 0x1c9   :  { %804 = vst [vmem:[%s1337_s4 + $0x68] sm:$0xff] %v745_v11  ;;  %v747_v13 = vadd.f32 %v746_v12, %v1201_v46 }
 0x1ca   :  { %v748_v14 = vpop.f32.mrf.mxu1 }
 0x1cb   :  { %805 = vst [vmem:[%s1337_s4 + $0x70] sm:$0xff] %v747_v13  ;;  %v749_v15 = vadd.f32 %v748_v14, %v1203_v47 }
 0x1cc   :  { %v752_v16 = vpop.f32.mrf.mxu1 }
 0x1cd   :  { %806 = vst [vmem:[%s1337_s4 + $0x78] sm:$0xff] %v749_v15  ;;  %v753_v17 = vadd.f32 %v752_v16, %v1201_v46 }
 0x1ce   :  { %v754_v18 = vpop.f32.mrf.mxu1 }
 0x1cf   :  { %807 = vst [vmem:[%s1337_s4 + $0x80] sm:$0xff] %v753_v17  ;;  %v755_v19 = vadd.f32 %v754_v18, %v1203_v47 }
 0x1d0   :  { %v756_v20 = vpop.f32.mrf.mxu1 }
 0x1d1   :  { %808 = vst [vmem:[%s1337_s4 + $0x88] sm:$0xff] %v755_v19  ;;  %v757_v21 = vadd.f32 %v756_v20, %v1201_v46 }
 0x1d2   :  { %v758_v22 = vpop.f32.mrf.mxu1 }
 0x1d3   :  { %809 = vst [vmem:[%s1337_s4 + $0x90] sm:$0xff] %v757_v21  ;;  %v759_v23 = vadd.f32 %v758_v22, %v1203_v47 }
 0x1d4   :  { %v762_v24 = vpop.f32.mrf.mxu1 }
 0x1d5   :  { %810 = vst [vmem:[%s1337_s4 + $0x98] sm:$0xff] %v759_v23  ;;  %v763_v25 = vadd.f32 %v762_v24, %v1201_v46 }
 0x1d6   :  { %v764_v26 = vpop.f32.mrf.mxu1 }
 0x1d7   :  { %811 = vst [vmem:[%s1337_s4 + $0xa0] sm:$0xff] %v763_v25  ;;  %v765_v27 = vadd.f32 %v764_v26, %v1203_v47 }
 0x1d8   :  { %v766_v28 = vpop.f32.mrf.mxu1 }
 0x1d9   :  { %812 = vst [vmem:[%s1337_s4 + $0xa8] sm:$0xff] %v765_v27  ;;  %v767_v29 = vadd.f32 %v766_v28, %v1201_v46 }
 0x1da   :  { %v768_v30 = vpop.f32.mrf.mxu1 }
 0x1db   :  { %813 = vst [vmem:[%s1337_s4 + $0xb0] sm:$0xff] %v767_v29  ;;  %v769_v31 = vadd.f32 %v768_v30, %v1203_v47 }
 0x1dc   :  { %v772_v32 = vpop.f32.mrf.mxu1 }
 0x1dd   :  { %814 = vst [vmem:[%s1337_s4 + $0xb8] sm:$0xff] %v769_v31  ;;  %v773_v33 = vadd.f32 %v772_v32, %v1201_v46 }
 0x1de   :  { %v774_v34 = vpop.f32.mrf.mxu1 }
 0x1df   :  { %815 = vst [vmem:[%s1337_s4 + $0xc0] sm:$0xff] %v773_v33  ;;  %v775_v35 = vadd.f32 %v774_v34, %v1203_v47 }
 0x1e0   :  { %v776_v36 = vpop.f32.mrf.mxu1 }
 0x1e1   :  { %816 = vst [vmem:[%s1337_s4 + $0xc8] sm:$0xff] %v775_v35  ;;  %v777_v37 = vadd.f32 %v776_v36, %v1201_v46 }
 0x1e2   :  { %v778_v38 = vpop.f32.mrf.mxu1 }
 0x1e3   :  { %817 = vst [vmem:[%s1337_s4 + $0xd0] sm:$0xff] %v777_v37  ;;  %v779_v39 = vadd.f32 %v778_v38, %v1203_v47 }
 0x1e4   :  { %v782_v40 = vpop.f32.mrf.mxu1 }
 0x1e5   :  { %818 = vst [vmem:[%s1337_s4 + $0xd8] sm:$0xff] %v779_v39  ;;  %v783_v41 = vadd.f32 %v782_v40, %v1201_v46 }
 0x1e6   :  { %v784_v42 = vpop.f32.mrf.mxu1 }
 0x1e7   :  { %819 = vst [vmem:[%s1337_s4 + $0xe0] sm:$0xff] %v783_v41  ;;  %v785_v43 = vadd.f32 %v784_v42, %v1203_v47 }
 0x1e8   :  { %v786_v44 = vpop.f32.mrf.mxu1 }
 0x1e9   :  { %820 = vst [vmem:[%s1337_s4 + $0xe8] sm:$0xff] %v785_v43  ;;  %v787_v45 = vadd.f32 %v786_v44, %v1201_v46 }
 0x1ea   :  { %v788_v48 = vpop.f32.mrf.mxu1 }
 0x1eb   :  { %821 = vst [vmem:[%s1337_s4 + $0xf0] sm:$0xff] %v787_v45  ;;  %v789_v49 = vadd.f32 %v788_v48, %v1203_v47 }
 0x1ed   :  { %822 = vst [vmem:[%s1337_s4 + $0xf8] sm:$0xff] %v789_v49 }

// kernel: encoder_forward.7
= control target key start
LH: loop header
LB: loop body
LE: loop exit
PB: predicated region body
PF: predicated region fallthrough
CT: control target
= control target key end

     0   :  { %s1052_s26 = smov 0   ;;  %s1453_s0 = inlined_call_operand.vmem [shape: f32[128,128], index: 0, kind: input, shape index: {}]   ;;  %s1454_s1 = inlined_call_operand.vmem [shape: bf16[128,128], index: 1, kind: input, shape index: {}]   ;;  %s1455_s2 = inlined_call_operand.vmem [shape: f32[1,128], index: 2, kind: input, shape index: {}]   ;;  %s1456_s3 = inlined_call_operand.vmem [shape: f32[1,128], index: 3, kind: input, shape index: {}]   ;;  %s1457_s4 = inlined_call_operand.vmem [shape: f32[1,128], index: 4, kind: input, shape index: {}]   ;;  %s1458_s5 = inlined_call_operand.<no memory space> [shape: f32[1], index: 5, kind: input, shape index: {}]   ;;  %s1459_s6 = inlined_call_operand.vmem [shape: f32[2,128,128], index: 6, kind: input, shape index: {}]   ;;  %s1460_s7 = inlined_call_operand.vmem [shape: f32[2,128,128], index: 7, kind: output, shape index: {}]  }
   0x1   :  { %12 = sst [smem:[#allocation2]] %s1458_s5 }
   0x2 LB: > { %s895_s27 = sadd.s32 4294967295, %s1007_s26   ;;  %p899_p0 = scmp.ge.s32.totalorder %s1007_s26, 1  ;;  %s1007_s26 = sphi %s1052_s26, %s18_s26  }
   0x3   : > { %p238_p1 = scmp.lt.s32.totalorder %s1007_s26, 3 }
   0x5   : > { %p239_p2 = pnand %p899_p0, %p238_p1 }
   0x6   : > { %s710_s10 = sld [smem:[#allocation2]] (!%p239_p2)  ;;  %p270_p3 = scmp.lt.s32.totalorder (!%p239_p2), %s895_s27, 1 }
   0x7   : > { %242 = sbr.rel (%p239_p2) target bundleno = 397 (0x18d), region = 48 }
   0xc   : > { %v991_v0 = vld [vmem:[%s1454_s1 + $0x38] sm:$0xff]   ;;  %v992_v1 = vld [vmem:[%s1454_s1 + $0x30] sm:$0xff]   ;;  %v993_v2 = vld [vmem:[%s1454_s1 + $0x28] sm:$0xff]   ;;  %s1477_s27 = smov (!%p270_p3, %s895_s27), 1 }
   0xd   : > { %935 = vmatprep.subr.bf16.mxu0 %v991_v0  ;;  %967 = vmatprep.subr.bf16.mxu1 %v991_v0  ;;  %v994_v3 = vld [vmem:[%s1454_s1 + $0x20] sm:$0xff]   ;;  %v282_v5 = vld [vmem:[%s1453_s0 + $0x8] sm:$0xff]  ;;  %v995_v9 = vld [vmem:[%s1454_s1 + $0x18] sm:$0xff]   ;;  %s917_s15 = sshll.u32 %s1477_s27, 7 }
   0xe   : > { %936 = vmatpush3.bf16.msra.mxu0 %v991_v0  ;;  %975 = vmatpush3.bf16.msra.mxu1 %v991_v0  ;;  %v281_v4 = vld [vmem:[%s1453_s0] sm:$0xff]  ;;  %v290_v8 = vld [vmem:[%s1453_s0 + $0x48] sm:$0xff]  ;;  %v996_v11 = vld [vmem:[%s1454_s1 + $0x10] sm:$0xff]   ;;  %s1209_s18 = scalar_lea.vmem %s1459_s6, %s917_s15  ;;  %s1400_s21 = scalar_lea.vmem %s1460_s7, %s917_s15 }
   0xf   : > { %937 = vmatprep.subr.bf16.mxu0 %v992_v1  ;;  %968 = vmatprep.subr.bf16.mxu1 %v992_v1  ;;  %v297_v6 = vpack.c.bf16 %v282_v5, %v281_v4  ;;  %v289_v7 = vld [vmem:[%s1453_s0 + $0x40] sm:$0xff]  ;;  %v997_v12 = vld [vmem:[%s1454_s1 + $0x8] sm:$0xff]   ;;  %v283_v14 = vld [vmem:[%s1453_s0 + $0x10] sm:$0xff] }
  0x10   : > { %v301_v10 = vpack.c.bf16 %v290_v8, %v289_v7  ;;  %v998_v13 = vld [vmem:[%s1454_s1] sm:$0xff]   ;;  %v284_v15 = vld [vmem:[%s1453_s0 + $0x18] sm:$0xff]  ;;  %v291_v17 = vld [vmem:[%s1453_s0 + $0x50] sm:$0xff] }
  0x11   : > { %951 = vmatprep.mubr.bf16.mxu0 %v297_v6  ;;  %v285_v16 = vld [vmem:[%s1453_s0 + $0x20] sm:$0xff]  ;;  %v292_v18 = vld [vmem:[%s1453_s0 + $0x58] sm:$0xff]  ;;  %v286_v19 = vld [vmem:[%s1453_s0 + $0x28] sm:$0xff]  ;;  %v298_v22 = vpack.c.bf16 %v284_v15, %v283_v14 }
  0x12   : > { %938 = vmatpush3.bf16.msra.mxu0 %v992_v1  ;;  %976 = vmatpush3.bf16.msra.mxu1 %v992_v1  ;;  %v293_v20 = vld [vmem:[%s1453_s0 + $0x60] sm:$0xff]  ;;  %v294_v21 = vld [vmem:[%s1453_s0 + $0x68] sm:$0xff]  ;;  %v302_v23 = vpack.c.bf16 %v292_v18, %v291_v17  ;;  %v299_v24 = vpack.c.bf16 %v286_v19, %v285_v16  ;;  %v287_v26 = vld [vmem:[%s1453_s0 + $0x30] sm:$0xff] }
  0x13   : > { %939 = vmatprep.subr.bf16.mxu0 %v993_v2  ;;  %969 = vmatprep.subr.bf16.mxu1 %v993_v2  ;;  %v303_v25 = vpack.c.bf16 %v294_v21, %v293_v20  ;;  %v288_v27 = vld [vmem:[%s1453_s0 + $0x38] sm:$0xff]  ;;  %v295_v28 = vld [vmem:[%s1453_s0 + $0x70] sm:$0xff]  ;;  %v904_v34 = vld [vmem:[%s1455_s2] ss:$0 sm:$0xff] }
  0x14   : > { %959 = vmatprep.mubr.bf16.mxu1 %v301_v10  ;;  %v296_v29 = vld [vmem:[%s1453_s0 + $0x78] sm:$0xff]  ;;  %v300_v30 = vpack.c.bf16 %v288_v27, %v287_v26 }
  0x15   : > { %v304_v31 = vpack.c.bf16 %v296_v29, %v295_v28 }
  0x16   : > { %940 = vmatpush3.bf16.msra.mxu0 %v993_v2  ;;  %977 = vmatpush3.bf16.msra.mxu1 %v993_v2 }
  0x17   : > { %941 = vmatprep.subr.bf16.mxu0 %v994_v3  ;;  %970 = vmatprep.subr.bf16.mxu1 %v994_v3 }
  0x1a   : > { %942 = vmatpush3.bf16.msra.mxu0 %v994_v3  ;;  %978 = vmatpush3.bf16.msra.mxu1 %v994_v3 }
  0x1b   : > { %943 = vmatprep.subr.bf16.mxu0 %v995_v9  ;;  %971 = vmatprep.subr.bf16.mxu1 %v995_v9 }
  0x1e   : > { %944 = vmatpush3.bf16.msra.mxu0 %v995_v9  ;;  %979 = vmatpush3.bf16.msra.mxu1 %v995_v9 }
  0x1f   : > { %945 = vmatprep.subr.bf16.mxu0 %v996_v11  ;;  %972 = vmatprep.subr.bf16.mxu1 %v996_v11 }
  0x22   : > { %946 = vmatpush3.bf16.msra.mxu0 %v996_v11  ;;  %980 = vmatpush3.bf16.msra.mxu1 %v996_v11 }
  0x23   : > { %947 = vmatprep.subr.bf16.mxu0 %v997_v12  ;;  %973 = vmatprep.subr.bf16.mxu1 %v997_v12 }
  0x26   : > { %948 = vmatpush3.bf16.msra.mxu0 %v997_v12  ;;  %981 = vmatpush3.bf16.msra.mxu1 %v997_v12 }
  0x27   : > { %949 = vmatprep.subr.bf16.mxu0 %v998_v13  ;;  %974 = vmatprep.subr.bf16.mxu1 %v998_v13 }
  0x2a   : > { %950 = vmatpush3.bf16.msra.mxu0 %v998_v13  ;;  %982 = vmatpush3.bf16.msra.mxu1 %v998_v13 }
  0x2d   : > { %952 = vmatmul.mubr.bf16.vlgmr.msra.gmra.mxu0 %v298_v22  ;;  %960 = vmatmul.mubr.bf16.vlgmr.msra.gmra.mxu1 %v302_v23 }
  0x2e   : > { %955 = vmatprep.mubr.bf16.mxu0 %v299_v24  ;;  %963 = vmatprep.mubr.bf16.mxu1 %v303_v25 }
  0x35   : > { %956 = vmatmul.mubr.bf16.gmra.mxu0 %v300_v30  ;;  %964 = vmatmul.mubr.bf16.gmra.mxu1 %v304_v31 }
  0xed   : > { %v953_v32 = vpop.f32.mrf.mxu0  ;;  %v961_v33 = vpop.f32.mrf.mxu1 }
  0xee   : > { %v1135_v38 = vadd.f32 %v953_v32, %v904_v34  ;;  %v451_v6 = vadd.f32 %v961_v33, %v904_v34 }
  0xef   : > { %v410_v35 = vpop.f32.mrf.mxu0  ;;  %v442_v36 = vpop.f32.mrf.mxu1 }
  0xf0   : > { %v411_v41 = vadd.f32 %v904_v34, %v410_v35  ;;  %v540_v45 = vmul.f32 0.0, %v1135_v38  ;;  %v443_v0 = vadd.f32 %v904_v34, %v442_v36  ;;  %v548_v13 = vmul.f32 0.0, %v451_v6 }
  0xf1   : > { %v954_v37 = vpop.f32.mrf.mxu0  ;;  %v962_v40 = vpop.f32.mrf.mxu1 }
  0xf2   : > { %v422_v42 = vadd.f32 %v954_v37, %v904_v34  ;;  %v546_v7 = vmul.f32 0.0, %v443_v0  ;;  %v454_v9 = vadd.f32 %v962_v40, %v904_v34 }
  0xf3   : > { %v413_v39 = vpop.f32.mrf.mxu0  ;;  %v445_v48 = vpop.f32.mrf.mxu1 }
  0xf4   : > { %v414_v43 = vadd.f32 %v904_v34, %v413_v39  ;;  %v541_v49 = vmul.f32 0.0, %v422_v42  ;;  %v446_v4 = vadd.f32 %v904_v34, %v445_v48  ;;  %v549_v16 = vmul.f32 0.0, %v454_v9 }
  0xf5   : > { %v957_v44 = vpop.f32.mrf.mxu0  ;;  %v965_v56 = vpop.f32.mrf.mxu1 }
  0xf6   : > { %v554_v46 = vadd.f32 %v414_v43, %v411_v41  ;;  %v435_v57 = vadd.f32 %v957_v44, %v904_v34  ;;  %v547_v10 = vmul.f32 0.0, %v446_v4  ;;  %v467_v19 = vadd.f32 %v965_v56, %v904_v34 }
  0xf7   : > { %v426_v47 = vpop.f32.mrf.mxu0  ;;  %v458_v62 = vpop.f32.mrf.mxu1 }
  0xf8   : > { %v555_v50 = vadd.f32 %v554_v46, %v540_v45  ;;  %v427_v51 = vadd.f32 %v904_v34, %v426_v47  ;;  %v544_v63 = vmul.f32 0.0, %v435_v57  ;;  %v459_v15 = vadd.f32 %v904_v34, %v458_v62 }
  0xf9   : > { %v958_v52 = vpop.f32.mrf.mxu0  ;;  %v966_v5 = vpop.f32.mrf.mxu1  ;;  %v552_v25 = vmul.f32 0.0, %v467_v19 }
  0xfa   : > { %v542_v53 = vmul.f32 0.0, %v427_v51  ;;  %v556_v54 = vadd.f32 %v555_v50, %v541_v49  ;;  %v438_v60 = vadd.f32 %v958_v52, %v904_v34  ;;  %v550_v20 = vmul.f32 0.0, %v459_v15 }
  0xfb   : > { %v429_v55 = vpop.f32.mrf.mxu0  ;;  %v461_v12 = vpop.f32.mrf.mxu1  ;;  %v470_v23 = vadd.f32 %v966_v5, %v904_v34 }
  0xfc   : > { %v430_v58 = vadd.f32 %v904_v34, %v429_v55  ;;  %v557_v59 = vadd.f32 %v556_v54, %v542_v53  ;;  %v545_v2 = vmul.f32 0.0, %v438_v60  ;;  %v462_v18 = vadd.f32 %v904_v34, %v461_v12 }
  0xfd   : > { %v553_v27 = vmul.f32 0.0, %v470_v23 }
  0xfe   : > { %v543_v61 = vmul.f32 0.0, %v430_v58  ;;  %v551_v24 = vmul.f32 0.0, %v462_v18 }
 0x100   : > { %v558_v1 = vadd.f32 %v557_v59, %v543_v61 }
 0x102   : > { %v559_v3 = vadd.f32 %v558_v1, %v544_v63 }
 0x104   : > { %v560_v8 = vadd.f32 %v559_v3, %v545_v2 }
 0x106   : > { %v561_v11 = vadd.f32 %v560_v8, %v546_v7 }
 0x108   : > { %v562_v14 = vadd.f32 %v561_v11, %v547_v10 }
 0x10a   : > { %v563_v17 = vadd.f32 %v562_v14, %v548_v13 }
 0x10c   : > { %v564_v21 = vadd.f32 %v563_v17, %v549_v16 }
 0x10e   : > { %v565_v22 = vadd.f32 %v564_v21, %v550_v20 }
 0x110   : > { %v566_v26 = vadd.f32 %v565_v22, %v551_v24 }
 0x112   : > { %v567_v28 = vadd.f32 %v566_v26, %v552_v25 }
 0x114   : > { %v568_v29 = vadd.f32 %v567_v28, %v553_v27 }
 0x116   : > { %v569_v30 = vrot.slane %v568_v29, 4 }
 0x118   : > { %v570_v31 = vadd.f32 %v569_v30, %v568_v29 }
 0x11a   : > { %v571_v32 = vrot.slane %v570_v31, 2 }
 0x11c   : > { %v572_v33 = vadd.f32 %v571_v32, %v570_v31 }
 0x11e   : > { %v573_v35 = vrot.slane %v572_v33, 1 }
 0x120   : > { %v574_v36 = vadd.f32 %v573_v35, %v572_v33 }
 0x122   : > { %v575_v37 = vmul.f32 0.0625, %v574_v36 }
 0x124   : > { %v1139_v39 = vsub.f32 %v1135_v38, %v575_v37  ;;  %v1141_v40 = vsub.f32 %v411_v41, %v575_v37  ;;  %v1143_v44 = vsub.f32 %v414_v43, %v575_v37  ;;  %v1145_v34 = vsub.f32 %v422_v42, %v575_v37 }
 0x125   : > { %v1148_v46 = vsub.f32 %v427_v51, %v575_v37  ;;  %v1154_v49 = vsub.f32 %v430_v58, %v575_v37  ;;  %v1157_v50 = vsub.f32 %v435_v57, %v575_v37  ;;  %v1160_v52 = vsub.f32 %v438_v60, %v575_v37 }
 0x126   : > { %v594_v45 = vmul.f32 0.0, %v1139_v39  ;;  %v608_v47 = vmul.f32 %v1141_v40, %v1141_v40  ;;  %v609_v48 = vmul.f32 %v1143_v44, %v1143_v44  ;;  %v595_v38 = vmul.f32 0.0, %v1145_v34 }
 0x127   : > { %v596_v42 = vmul.f32 0.0, %v1148_v46  ;;  %v597_v51 = vmul.f32 0.0, %v1154_v49  ;;  %v1163_v55 = vsub.f32 %v443_v0, %v575_v37  ;;  %v598_v56 = vmul.f32 0.0, %v1157_v50 }
 0x128   : > { %v610_v41 = vmul.f32 %v594_v45, %v594_v45  ;;  %v624_v43 = vadd.f32 %v609_v48, %v608_v47  ;;  %v611_v53 = vmul.f32 %v595_v38, %v595_v38  ;;  %v1166_v61 = vsub.f32 %v446_v4, %v575_v37 }
 0x129   : > { %v612_v58 = vmul.f32 %v596_v42, %v596_v42  ;;  %v599_v57 = vmul.f32 0.0, %v1160_v52  ;;  %v613_v62 = vmul.f32 %v597_v51, %v597_v51  ;;  %v586_v1 = vsub.f32 %v451_v6, %v575_v37 }
 0x12a   : > { %v625_v54 = vadd.f32 %v624_v43, %v610_v41  ;;  %v600_v60 = vmul.f32 0.0, %v1163_v55  ;;  %v614_v2 = vmul.f32 %v598_v56, %v598_v56  ;;  %v587_v5 = vsub.f32 %v454_v9, %v575_v37 }
 0x12b   : > { %v601_v7 = vmul.f32 0.0, %v1166_v61  ;;  %v615_v0 = vmul.f32 %v599_v57, %v599_v57  ;;  %v588_v10 = vsub.f32 %v459_v15, %v575_v37  ;;  %v602_v11 = vmul.f32 0.0, %v586_v1 }
 0x12c   : > { %v626_v59 = vadd.f32 %v625_v54, %v611_v53  ;;  %v616_v12 = vmul.f32 %v600_v60, %v600_v60  ;;  %v589_v4 = vsub.f32 %v462_v18, %v575_v37  ;;  %v603_v14 = vmul.f32 0.0, %v587_v5 }
 0x12d   : > { %v617_v16 = vmul.f32 %v601_v7, %v601_v7  ;;  %v590_v20 = vsub.f32 %v467_v19, %v575_v37  ;;  %v604_v21 = vmul.f32 0.0, %v588_v10  ;;  %v618_v6 = vmul.f32 %v602_v11, %v602_v11 }
 0x12e   : > { %v627_v63 = vadd.f32 %v626_v59, %v612_v58  ;;  %v591_v24 = vsub.f32 %v470_v23, %v575_v37  ;;  %v605_v25 = vmul.f32 0.0, %v589_v4  ;;  %v619_v26 = vmul.f32 %v603_v14, %v603_v14 }
 0x12f   : > { %v606_v27 = vmul.f32 0.0, %v590_v20  ;;  %v620_v28 = vmul.f32 %v604_v21, %v604_v21  ;;  %v1173_v43 = vstv %s710_s10 }
 0x130   : > { %v628_v3 = vadd.f32 %v627_v63, %v613_v62  ;;  %v607_v30 = vmul.f32 0.0, %v591_v24  ;;  %v621_v15 = vmul.f32 %v605_v25, %v605_v25  ;;  %v913_v63 = vld [vmem:[%s1456_s3] ss:$0 sm:$0xff] }
 0x131   : > { %v622_v32 = vmul.f32 %v606_v27, %v606_v27 }
 0x132   : > { %v629_v8 = vadd.f32 %v628_v3, %v614_v2  ;;  %v623_v33 = vmul.f32 %v607_v30, %v607_v30 }
 0x134   : > { %v630_v13 = vadd.f32 %v629_v8, %v615_v0 }
 0x136   : > { %v631_v17 = vadd.f32 %v630_v13, %v616_v12 }
 0x138   : > { %v632_v22 = vadd.f32 %v631_v17, %v617_v16 }
 0x13a   : > { %v633_v9 = vadd.f32 %v632_v22, %v618_v6 }
 0x13c   : > { %v634_v29 = vadd.f32 %v633_v9, %v619_v26 }
 0x13e   : > { %v635_v31 = vadd.f32 %v634_v29, %v620_v28 }
 0x140   : > { %v636_v18 = vadd.f32 %v635_v31, %v621_v15 }
 0x142   : > { %v637_v35 = vadd.f32 %v636_v18, %v622_v32  ;;  %v1240_v18 = vld [vmem:[%s1209_s18] sm:$0xff] }
 0x144   : > { %v638_v36 = vadd.f32 %v637_v35, %v623_v33  ;;  %v1243_v33 = vld [vmem:[%s1209_s18 + $0x8] sm:$0xff]  ;;  %v1246_v35 = vld [vmem:[%s1209_s18 + $0x10] sm:$0xff] }
 0x146   : > { %v639_v19 = vrot.slane %v638_v36, 4 }
 0x148   : > { %v640_v45 = vadd.f32 %v639_v19, %v638_v36  ;;  %v1249_v36 = vld [vmem:[%s1209_s18 + $0x18] sm:$0xff]  ;;  %v1256_v19 = vld [vmem:[%s1209_s18 + $0x20] sm:$0xff] }
 0x14a   : > { %v641_v47 = vrot.slane %v640_v45, 2 }
 0x14c   : > { %v642_v48 = vadd.f32 %v641_v47, %v640_v45  ;;  %v1259_v45 = vld [vmem:[%s1209_s18 + $0x28] sm:$0xff]  ;;  %v1266_v47 = vld [vmem:[%s1209_s18 + $0x30] sm:$0xff] }
 0x14e   : > { %v643_v23 = vrot.slane %v642_v48, 1 }
 0x150   : > { %v644_v37 = vadd.f32 %v643_v23, %v642_v48  ;;  %v1269_v48 = vld [vmem:[%s1209_s18 + $0x38] sm:$0xff]  ;;  %v1276_v23 = vld [vmem:[%s1209_s18 + $0x40] sm:$0xff] }
 0x151   : > { %vm784_vm15 = vcmp.ge.f32.partialorder %v1276_v23, 0.2 }
 0x152   : > { %v645_v38 = vmul.f32 0.0625, %v644_v37  ;;  %v1279_v37 = vld [vmem:[%s1209_s18 + $0x48] sm:$0xff] }
 0x154   : > { %v646_v41 = vadd.f32 1e-05, %v645_v38 }
 0x156   : > { %999 = vrsqrt.f32 %v646_v41 }
 0x163   : > { %v1000_v42 = vpop.eup %999 }
 0x164   : > { %v648_v51 = vmul.f32 %v1000_v42, %v1141_v40  ;;  %v649_v53 = vmul.f32 %v1000_v42, %v1143_v44  ;;  %v650_v54 = vmul.f32 %v1000_v42, %v1139_v39  ;;  %v651_v56 = vmul.f32 %v1000_v42, %v1145_v34 }
 0x165   : > { %v652_v58 = vmul.f32 %v1000_v42, %v1148_v46  ;;  %v653_v59 = vmul.f32 %v1000_v42, %v1154_v49  ;;  %v654_v57 = vmul.f32 %v1000_v42, %v1157_v50  ;;  %v655_v62 = vmul.f32 %v1000_v42, %v1160_v52 }
 0x166   : > { %v656_v40 = vmul.f32 %v1000_v42, %v1163_v55  ;;  %v657_v39 = vmul.f32 %v1000_v42, %v1166_v61  ;;  %v658_v44 = vmul.f32 %v1000_v42, %v586_v1  ;;  %v659_v34 = vmul.f32 %v1000_v42, %v587_v5  ;;  %v914_v55 = vld [vmem:[%s1457_s4] ss:$0 sm:$0xff] }
 0x167   : > { %v660_v46 = vmul.f32 %v1000_v42, %v588_v10  ;;  %v661_v49 = vmul.f32 %v1000_v42, %v589_v4  ;;  %v662_v60 = vmul.f32 %v1000_v42, %v590_v20  ;;  %v663_v50 = vmul.f32 %v1000_v42, %v591_v24 }
 0x168   : > { %v671_v2 = vmul.f32 %v913_v63, %v648_v51  ;;  %v672_v52 = vmul.f32 %v913_v63, %v649_v53  ;;  %v673_v3 = vmul.f32 %v913_v63, %v650_v54  ;;  %v674_v7 = vmul.f32 %v913_v63, %v651_v56  ;;  %v1290_v53 = vld [vmem:[%s1209_s18 + $0x50] sm:$0xff]  ;;  %v1293_v54 = vld [vmem:[%s1209_s18 + $0x58] sm:$0xff]  ;;  %v1296_v56 = vld [vmem:[%s1209_s18 + $0x60] sm:$0xff] }
 0x169   : > { %v675_v0 = vmul.f32 %v913_v63, %v652_v58  ;;  %v676_v8 = vmul.f32 %v913_v63, %v653_v59  ;;  %v677_v11 = vmul.f32 %v913_v63, %v654_v57  ;;  %v678_v12 = vmul.f32 %v913_v63, %v655_v62 }
 0x16a   : > { %v679_v61 = vmul.f32 %v913_v63, %v656_v40  ;;  %v680_v1 = vmul.f32 %v913_v63, %v657_v39  ;;  %v681_v5 = vmul.f32 %v913_v63, %v658_v44  ;;  %v682_v10 = vmul.f32 %v913_v63, %v659_v34  ;;  %v1310_v40 = vld [vmem:[%s1209_s18 + $0x70] sm:$0xff]  ;;  %v1313_v39 = vld [vmem:[%s1209_s18 + $0x78] sm:$0xff] }
 0x16b   : > { %v683_v13 = vmul.f32 %v913_v63, %v660_v46  ;;  %v684_v4 = vmul.f32 %v913_v63, %v661_v49  ;;  %v685_v14 = vmul.f32 %v913_v63, %v662_v60  ;;  %v686_v16 = vmul.f32 %v913_v63, %v663_v50  ;;  %v1307_v63 = vld [vmem:[%s1209_s18 + $0x68] sm:$0xff] }
 0x16c   : > { %v1196_v17 = vadd.f32 %v914_v55, %v671_v2  ;;  %v1198_v20 = vadd.f32 %v914_v55, %v672_v52  ;;  %v1200_v21 = vadd.f32 %v914_v55, %v673_v3  ;;  %v1202_v6 = vadd.f32 %v914_v55, %v674_v7 }
 0x16d   : > { %v1211_v22 = vadd.f32 %v914_v55, %v675_v0  ;;  %v1213_v24 = vadd.f32 %v914_v55, %v676_v8  ;;  %v1215_v25 = vadd.f32 %v914_v55, %v677_v11  ;;  %v1217_v26 = vadd.f32 %v914_v55, %v678_v12 }
 0x16e   : > { %v1219_v9 = vadd.f32 %v914_v55, %v679_v61  ;;  %v1221_v27 = vadd.f32 %v914_v55, %v680_v1  ;;  %v1223_v28 = vadd.f32 %v914_v55, %v681_v5  ;;  %v1225_v29 = vadd.f32 %v914_v55, %v682_v10 }
 0x16f   : > { %v1227_v30 = vadd.f32 %v914_v55, %v683_v13  ;;  %v1229_v15 = vadd.f32 %v914_v55, %v684_v4  ;;  %v1231_v31 = vadd.f32 %v914_v55, %v685_v14  ;;  %v1233_v32 = vadd.f32 %v914_v55, %v686_v16 }
 0x170   : > { %vm711_vm0 = vcmp.gt.f32.partialorder %v1196_v17, 0.0  ;;  %vm712_vm1 = vcmp.gt.f32.partialorder %v1198_v20, 0.0  ;;  %vm713_vm2 = vcmp.gt.f32.partialorder %v1200_v21, 0.0  ;;  %vm714_vm3 = vcmp.gt.f32.partialorder %v1202_v6, 0.0 }
 0x171   : > { %vm715_vm4 = vcmp.gt.f32.partialorder %v1211_v22, 0.0  ;;  %vm716_vm5 = vcmp.gt.f32.partialorder %v1213_v24, 0.0  ;;  %vm717_vm6 = vcmp.gt.f32.partialorder %v1215_v25, 0.0  ;;  %vm718_vm7 = vcmp.gt.f32.partialorder %v1217_v26, 0.0 }
 0x172   : > { %vm719_vm8 = vcmp.gt.f32.partialorder %v1219_v9, 0.0  ;;  %vm720_vm9 = vcmp.gt.f32.partialorder %v1221_v27, 0.0  ;;  %vm721_vm10 = vcmp.gt.f32.partialorder %v1223_v28, 0.0  ;;  %vm722_vm11 = vcmp.gt.f32.partialorder %v1225_v29, 0.0 }
 0x173   : > { %v728_v38 = vmul.f32 %v1173_v43, %v1196_v17  ;;  %v729_v41 = vmul.f32 %v1173_v43, %v1198_v20  ;;  %v730_v42 = vmul.f32 %v1173_v43, %v1200_v21  ;;  %v731_v51 = vmul.f32 %v1173_v43, %v1202_v6 }
 0x174   : > { %v732_v58 = vmul.f32 %v1173_v43, %v1211_v22  ;;  %v733_v59 = vmul.f32 %v1173_v43, %v1213_v24  ;;  %v734_v57 = vmul.f32 %v1173_v43, %v1215_v25  ;;  %v735_v62 = vmul.f32 %v1173_v43, %v1217_v26 }
 0x175   : > { %v736_v44 = vmul.f32 %v1173_v43, %v1219_v9  ;;  %v737_v34 = vmul.f32 %v1173_v43, %v1221_v27  ;;  %v738_v46 = vmul.f32 %v1173_v43, %v1223_v28  ;;  %v739_v49 = vmul.f32 %v1173_v43, %v1225_v29 }
 0x176   : > { %v740_v60 = vmul.f32 %v1173_v43, %v1227_v30  ;;  %v741_v50 = vmul.f32 %v1173_v43, %v1229_v15  ;;  %v742_v2 = vmul.f32 %v1173_v43, %v1231_v31  ;;  %v743_v52 = vmul.f32 %v1173_v43, %v1233_v32 }
 0x177   : > { %v744_v3 = vsel %vm711_vm0, %v1196_v17, %v728_v38  ;;  %v745_v7 = vsel %vm712_vm1, %v1198_v20, %v729_v41  ;;  %v746_v43 = vsel %vm713_vm2, %v1200_v21, %v730_v42  ;;  %v747_v0 = vsel %vm714_vm3, %v1202_v6, %v731_v51 }
 0x178   : > { %vm788_vm13 = vcmp.ge.f32.partialorder %v1296_v56, 0.2  ;;  %vm789_vm12 = vcmp.ge.f32.partialorder %v1307_v63, 0.2  ;;  %vm790_vm14 = vcmp.ge.f32.partialorder %v1310_v40, 0.2  ;;  %v748_v8 = vsel %vm715_vm4, %v1211_v22, %v732_v58 }
 0x179   : > { %vm791_vm0 = vcmp.ge.f32.partialorder %v1313_v39, 0.2  ;;  %v749_v11 = vsel %vm716_vm5, %v1213_v24, %v733_v59  ;;  %v750_v12 = vsel %vm717_vm6, %v1215_v25, %v734_v57  ;;  %v751_v55 = vsel %vm718_vm7, %v1217_v26, %v735_v62 }
 0x17a   : > { %v752_v61 = vsel %vm719_vm8, %v1219_v9, %v736_v44  ;;  %v753_v1 = vsel %vm720_vm9, %v1221_v27, %v737_v34  ;;  %v754_v5 = vsel %vm721_vm10, %v1223_v28, %v738_v46  ;;  %v755_v10 = vsel %vm722_vm11, %v1225_v29, %v739_v49 }
 0x17b   : > { %vm1461_vm1 = vcmp.gt.f32.partialorder %v1227_v30, 0.0  ;;  %vm1462_vm2 = vcmp.gt.f32.partialorder %v1229_v15, 0.0  ;;  %vm1463_vm3 = vcmp.gt.f32.partialorder %v1231_v31, 0.0  ;;  %vm1464_vm4 = vcmp.gt.f32.partialorder %v1233_v32, 0.0 }
 0x17c   : > { %v756_v13 = vsel %vm1461_vm1, %v1227_v30, %v740_v60  ;;  %v757_v4 = vsel %vm1462_vm2, %v1229_v15, %v741_v50  ;;  %v758_v14 = vsel %vm1463_vm3, %v1231_v31, %v742_v2  ;;  %v759_v16 = vsel %vm1464_vm4, %v1233_v32, %v743_v52 }
 0x17d   : > { %v792_v17 = vmul.f32 1.25, %v744_v3  ;;  %v793_v20 = vmul.f32 1.25, %v745_v7  ;;  %v794_v21 = vmul.f32 1.25, %v746_v43  ;;  %v795_v6 = vmul.f32 1.25, %v747_v0 }
 0x17e   : > { %v796_v22 = vmul.f32 1.25, %v748_v8  ;;  %v797_v24 = vmul.f32 1.25, %v749_v11  ;;  %v798_v25 = vmul.f32 1.25, %v750_v12  ;;  %v799_v26 = vmul.f32 1.25, %v751_v55 }
 0x17f   : > { %v800_v9 = vmul.f32 1.25, %v752_v61  ;;  %v801_v27 = vmul.f32 1.25, %v753_v1  ;;  %v802_v28 = vmul.f32 1.25, %v754_v5  ;;  %v803_v29 = vmul.f32 1.25, %v755_v10 }
 0x180   : > { %v804_v30 = vmul.f32 1.25, %v756_v13  ;;  %v805_v15 = vmul.f32 1.25, %v757_v4  ;;  %v806_v31 = vmul.f32 1.25, %v758_v14  ;;  %v807_v32 = vmul.f32 1.25, %v759_v16 }
 0x181   : > { %vm1465_vm5 = vcmp.ge.f32.partialorder %v1240_v18, 0.2  ;;  %vm1466_vm6 = vcmp.ge.f32.partialorder %v1243_v33, 0.2  ;;  %vm1467_vm7 = vcmp.ge.f32.partialorder %v1246_v35, 0.2 }
 0x182   : > { %v808_v38 = vsel %vm1465_vm5, %v792_v17, 0.0  ;;  %v809_v41 = vsel %vm1466_vm6, %v793_v20, 0.0  ;;  %v810_v42 = vsel %vm1467_vm7, %v794_v21, 0.0  ;;  %vm1468_vm8 = vcmp.ge.f32.partialorder %v1249_v36, 0.2 }
 0x183   : > { %v811_v51 = vsel %vm1468_vm8, %v795_v6, 0.0  ;;  %vm1469_vm9 = vcmp.ge.f32.partialorder %v1256_v19, 0.2  ;;  %vm1470_vm10 = vcmp.ge.f32.partialorder %v1259_v45, 0.2  ;;  %824 = vst [vmem:[%s1400_s21] sm:$0xff] %v808_v38  ;;  %825 = vst [vmem:[%s1400_s21 + $0x8] sm:$0xff] %v809_v41 }
 0x184   : > { %v812_v58 = vsel %vm1469_vm9, %v796_v22, 0.0  ;;  %v813_v18 = vsel %vm1470_vm10, %v797_v24, 0.0  ;;  %vm1471_vm11 = vcmp.ge.f32.partialorder %v1266_v47, 0.2  ;;  %vm1472_vm1 = vcmp.ge.f32.partialorder %v1269_v48, 0.2 }
 0x185   : > { %v814_v33 = vsel %vm1471_vm11, %v798_v25, 0.0  ;;  %v815_v59 = vsel %vm1472_vm1, %v799_v26, 0.0  ;;  %826 = vst [vmem:[%s1400_s21 + $0x10] sm:$0xff] %v810_v42  ;;  %827 = vst [vmem:[%s1400_s21 + $0x18] sm:$0xff] %v811_v51  ;;  %v816_v35 = vsel %vm784_vm15, %v800_v9, 0.0  ;;  %v820_v47 = vsel %vm788_vm13, %v804_v30, 0.0 }
 0x186   : > { %vm1473_vm2 = vcmp.ge.f32.partialorder %v1279_v37, 0.2  ;;  %vm1474_vm3 = vcmp.ge.f32.partialorder %v1290_v53, 0.2  ;;  %vm1475_vm4 = vcmp.ge.f32.partialorder %v1293_v54, 0.2 }
 0x187   : > { %v817_v36 = vsel %vm1473_vm2, %v801_v27, 0.0  ;;  %v818_v19 = vsel %vm1474_vm3, %v802_v28, 0.0  ;;  %v819_v45 = vsel %vm1475_vm4, %v803_v29, 0.0  ;;  %828 = vst [vmem:[%s1400_s21 + $0x20] sm:$0xff] %v812_v58  ;;  %829 = vst [vmem:[%s1400_s21 + $0x28] sm:$0xff] %v813_v18  ;;  %v821_v48 = vsel %vm789_vm12, %v805_v15, 0.0 }
 0x188   : > { %830 = vst [vmem:[%s1400_s21 + $0x30] sm:$0xff] %v814_v33  ;;  %831 = vst [vmem:[%s1400_s21 + $0x38] sm:$0xff] %v815_v59  ;;  %v822_v23 = vsel %vm790_vm14, %v806_v31, 0.0  ;;  %v823_v37 = vsel %vm791_vm0, %v807_v32, 0.0 }
 0x189   : > { %832 = vst [vmem:[%s1400_s21 + $0x40] sm:$0xff] %v816_v35  ;;  %833 = vst [vmem:[%s1400_s21 + $0x48] sm:$0xff] %v817_v36 }
 0x18a   : > { %834 = vst [vmem:[%s1400_s21 + $0x50] sm:$0xff] %v818_v19  ;;  %835 = vst [vmem:[%s1400_s21 + $0x58] sm:$0xff] %v819_v45 }
 0x18b   : > { %836 = vst [vmem:[%s1400_s21 + $0x60] sm:$0xff] %v820_v47  ;;  %837 = vst [vmem:[%s1400_s21 + $0x68] sm:$0xff] %v821_v48 }
 0x18c   : > { %838 = vst [vmem:[%s1400_s21 + $0x70] sm:$0xff] %v822_v23  ;;  %839 = vst [vmem:[%s1400_s21 + $0x78] sm:$0xff] %v823_v37 }
 0x18d PF: > { %s18_s26 = sadd.s32 1, %s1007_s26  }
 0x18e   : > { %p15_p4 = scmp.ge.s32.totalorder %s18_s26, 4  }
 0x190   :  { %17 = sbr.rel (!%p15_p4) target bundleno = 2 (0x2), region = 78 }

</bundles_post_ra>
